<compile_context>
chip_gen: v7x
topology: tpu7x:2x2x1
jax: 0.10.0
libtpu: 0.0.40
codegen_flags: <defaults>
</compile_context>

<pallas_src>
import numpy as np
import jax
import jax.numpy as jnp
from jax import lax
from jax.experimental import pallas as pl
from jax.experimental.pallas import tpu as pltpu


def _rel_pos_bias_kernel(table_ref, index_ref, out_ref):
    # table_ref: (H, R)  f32  -- pre-transposed bias table, resident across tiles
    # index_ref: (1, T)  i32  -- lane-dense tile of the flattened (L*L) index
    # out_ref:   (H, T)  f32  -- gathered bias tile, head-major, lane-dense
    R = table_ref.shape[1]
    T = index_ref.shape[1]

    idx = index_ref[...]                                   # (1, T)
    rows = lax.broadcasted_iota(jnp.int32, (R, T), 0)      # (R, T)
    one_hot = (rows == idx).astype(jnp.float32)            # (R, T), lane-dense in T

    # Canonical (H, R) . (R, T) -> (H, T) on the MXU.
    out_ref[...] = lax.dot_general(
        table_ref[...], one_hot,
        dimension_numbers=(((1,), (0,)), ((), ())),
        preferred_element_type=jnp.float32,
    )


def build_relative_position_index(window_size):
    """Exactly replicates the index construction in RelativePositionBias.__init__."""
    Wh, Ww = window_size
    num_relative_distance = (2 * Wh - 1) * (2 * Ww - 1) + 3
    coords_h = np.arange(Wh)
    coords_w = np.arange(Ww)
    coords = np.stack(np.meshgrid(coords_h, coords_w, indexing="ij"))   # (2, Wh, Ww)
    coords_flatten = coords.reshape(2, -1)                              # (2, Wh*Ww)
    relative_coords = coords_flatten[:, :, None] - coords_flatten[:, None, :]
    relative_coords = relative_coords.transpose(1, 2, 0).copy()         # (N, N, 2)
    relative_coords[:, :, 0] += Wh - 1
    relative_coords[:, :, 1] += Ww - 1
    relative_coords[:, :, 0] *= 2 * Ww - 1
    L = Wh * Ww + 1
    rpi = np.zeros((L, L), dtype=np.int64)
    rpi[1:, 1:] = relative_coords.sum(-1)
    rpi[0, 0:] = num_relative_distance - 3
    rpi[0:, 0] = num_relative_distance - 2
    rpi[0, 0] = num_relative_distance - 1
    return rpi, num_relative_distance


def _choose_tiling(L2, max_tile, R):
    # 128-align the requested tile (keeps BlockSpec lane constraint + unmasked
    # stores even for odd caller-supplied max_tile).
    max_tile = max(128, pl.cdiv(max_tile, 128) * 128)

    # Bound the (R, tile) one-hot + same-size iota intermediate (~2*R*tile*4 B)
    # so large windows / large R never overshoot v7x's 64 MiB VMEM.
    onehot_budget = 36 << 20
    while max_tile > 256 and 2 * R * max_tile * 4 > onehot_budget:
        max_tile = max(256, (max_tile // 2 // 128) * 128)

    n_tiles = pl.cdiv(L2, max_tile)
    # v7x has 2 TensorCores; an even tile count gives a balanced shard of the
    # single "parallel" grid axis (no cost on 1-TC v5e/v6e).
    if n_tiles > 1 and n_tiles % 2 == 1:
        n_tiles += 1
    tile = pl.cdiv(pl.cdiv(L2, n_tiles), 128) * 128
    return tile, n_tiles, tile * n_tiles


def relative_position_bias(table, rel_pos_index, window_size, num_heads,
                           *, max_tile=4096, force_pallas=False):
    """table: (num_relative_distance, num_heads) f32
       rel_pos_index: (L, L) int
       returns: (num_heads, L, L) f32  (== PyTorch permute(2, 0, 1) result)"""
    L = window_size[0] * window_size[1] + 1
    L2 = L * L
    R = table.shape[0]

    table_f32 = jnp.asarray(table, jnp.float32)                        # (R, H)
    idx_flat = jnp.asarray(rel_pos_index, jnp.int32).reshape(1, L2)    # packed (1, L2)

    # Tiny windows: a pallas_call's fixed launch/DMA latency dominates a few-KB
    # gather, and a single-step grid gets no pipelining or megacore sharding.
    if L2 < 1024 and not force_pallas:
        gathered = jnp.take(table_f32, idx_flat.reshape(-1), axis=0)   # (L2, H)
        return jnp.transpose(gathered.reshape(L, L, num_heads), (2, 0, 1))

    tile, n_tiles, L2_pad = _choose_tiling(L2, max_tile, R)

    # One-time (H, R) transpose outside the grid so the kernel matmul is in
    # canonical MXU orientation.
    table_t = table_f32.T                                              # (H, R)

    # Pad index columns with R (out of range) -> those one-hot columns are all
    # zero; the padded output region is zeros and sliced off below.
    idx_pad = jnp.pad(idx_flat, ((0, 0), (0, L2_pad - L2)), constant_values=R)

    # Rough per-step VMEM working set: one-hot + iota intermediates plus
    # double-buffered idx/out blocks and the resident table. Set an explicit
    # scoped limit so v5e's 16 MiB default never trips; cap at 48 MiB to stay
    # comfortably inside v7x's 64 MiB physical VMEM.
    vmem_estimate = (2 * R * tile * 4                      # one-hot + iota
                     + 2 * (tile * 4 + num_heads * tile * 4)
                     + 2 * num_heads * R * 4
                     + (4 << 20))
    vmem_limit = int(min(max(vmem_estimate, 32 << 20), 48 << 20))

    cost = pl.CostEstimate(
        flops=2 * num_heads * R * L2_pad,
        transcendentals=0,
        bytes_accessed=(table_t.size * 4 + idx_pad.size * 4
                        + num_heads * L2_pad * 4),
    )

    out_flat = pl.pallas_call(
        _rel_pos_bias_kernel,
        out_shape=jax.ShapeDtypeStruct((num_heads, L2_pad), jnp.float32),
        grid=(n_tiles,),
        in_specs=[
            pl.BlockSpec((num_heads, R), lambda i: (0, 0)),   # full table, resident
            pl.BlockSpec((1, tile), lambda i: (0, i)),        # index tile (lane-dense)
        ],
        out_specs=pl.BlockSpec((num_heads, tile), lambda i: (0, i)),
        compiler_params=pltpu.CompilerParams(
            dimension_semantics=("parallel",),                # shard tiles across TCs (v7x)
            vmem_limit_bytes=vmem_limit,
        ),
        cost_estimate=cost,
    )(table_t, idx_pad)

    # Glue slice+reshape (outside the hot path): (H, L2_pad) -> (H, L, L)
    return out_flat[:, :L2].reshape(num_heads, L, L)


def _reference(table, rel_pos_index, window_size, num_heads):
    L = window_size[0] * window_size[1] + 1
    t = jnp.asarray(table, jnp.float32)
    idx = jnp.asarray(rel_pos_index).reshape(-1)
    return jnp.transpose(t[idx].reshape(L, L, num_heads), (2, 0, 1))


if __name__ == "__main__":
    key = jax.random.PRNGKey(0)
    k1, k2 = jax.random.split(key)

    # Case 1: (8, 8) window -> L = 65, L2 = 4225, R = 228; goes through the
    # Pallas path with 2 lane tiles (even -> balanced on v7x megacore).
    ws1, h1 = (8, 8), 8
    rpi1, R1 = build_relative_position_index(ws1)
    table1 = jax.random.normal(k1, (R1, h1), dtype=jnp.float32)
    out1 = jax.block_until_ready(relative_position_bias(table1, rpi1, ws1, h1))
    ref1 = _reference(table1, rpi1, ws1, h1)
    L1 = ws1[0] * ws1[1] + 1
    assert out1.shape == (h1, L1, L1)
    np.testing.assert_allclose(np.asarray(out1), np.asarray(ref1),
                               rtol=1e-6, atol=1e-6)

    # Case 2: tiny (4, 4) window forced through the kernel (single tile), to
    # also exercise the n_tiles == 1 path.
    ws2, h2 = (4, 4), 8
    rpi2, R2 = build_relative_position_index(ws2)
    table2 = jax.random.normal(k2, (R2, h2), dtype=jnp.float32)
    out2 = jax.block_until_ready(
        relative_position_bias(table2, rpi2, ws2, h2, force_pallas=True))
    ref2 = _reference(table2, rpi2, ws2, h2)
    L2_ = ws2[0] * ws2[1] + 1
    assert out2.shape == (h2, L2_, L2_)
    np.testing.assert_allclose(np.asarray(out2), np.asarray(ref2),
                               rtol=1e-6, atol=1e-6)

    print("KERNEL_OK")
</pallas_src>

<mosaic_0001>
module attributes {stable_mosaic.version = 11 : i64} {
  func.func @_rel_pos_bias_kernel(%arg0: i32, %arg1: memref<8x228xf32, #tpu.memory_space<vmem>>, %arg2: memref<1x2176xi32, #tpu.memory_space<vmem>>, %arg3: memref<8x2176xf32, #tpu.memory_space<vmem>>) attributes {dimension_semantics = [#tpu.dimension_semantics<parallel>], iteration_bounds = array<i64: 2>, scalar_prefetch = 0 : i64, scratch_operands = 0 : i64, tpu.core_type = #tpu.core_type<tc>, window_params = [{pipeline_mode = #tpu.pipeline_mode<synchronous>, transform_indices = @transform_0, window_bounds = array<i64: 8, 228>}, {transform_indices = @transform_1, window_bounds = array<i64: 1, 2176>}, {transform_indices = @transform_2, window_bounds = array<i64: 8, 2176>}]} {
    %c0 = arith.constant 0 : index
    %c0_0 = arith.constant 0 : index
    %0 = vector.load %arg2[%c0, %c0_0] : memref<1x2176xi32, #tpu.memory_space<vmem>>, vector<1x2176xi32>
    %1 = tpu.iota {dimensions = array<i32: 0>} : vector<228x2176xi32>
    %2 = vector.broadcast %0 : vector<1x2176xi32> to vector<228x2176xi32>
    %3 = arith.cmpi eq, %1, %2 : vector<228x2176xi32>
    %4 = arith.extui %3 : vector<228x2176xi1> to vector<228x2176xi32>
    %5 = arith.sitofp %4 : vector<228x2176xi32> to vector<228x2176xf32>
    %c0_1 = arith.constant 0 : index
    %c0_2 = arith.constant 0 : index
    %6 = vector.load %arg1[%c0_1, %c0_2] : memref<8x228xf32, #tpu.memory_space<vmem>>, vector<8x228xf32>
    %cst = arith.constant dense<0.000000e+00> : vector<8x2176xf32>
    %7 = tpu.matmul %6, %5, %cst {dimension_numbers = #tpu.dot_dimension_numbers<[1], [0], [0], [1], [0, 0, 1, 1], [], []>} : vector<8x228xf32>, vector<228x2176xf32>, vector<8x2176xf32> -> vector<8x2176xf32>
    %c0_3 = arith.constant 0 : index
    %c0_4 = arith.constant 0 : index
    %8 = vector.load %arg3[%c0_3, %c0_4] : memref<8x2176xf32, #tpu.memory_space<vmem>>, vector<8x2176xf32>
    tpu.vector_store %arg3[%c0_3, %c0_4], %7 {strides = array<i32>} : memref<8x2176xf32, #tpu.memory_space<vmem>>, vector<8x2176xf32>,
    return
  }
  func.func @transform_0(%arg0: i32) -> (i32, i32) {
    %c0_i32 = arith.constant 0 : i32
    %c0_i32_0 = arith.constant 0 : i32
    %c0_i32_1 = arith.constant 0 : i32
    return %c0_i32, %c0_i32_0 : i32, i32
  }
  func.func @transform_1(%arg0: i32) -> (i32, i32) {
    %c0_i32 = arith.constant 0 : i32
    %c0_i32_0 = arith.constant 0 : i32
    return %c0_i32, %arg0 : i32, i32
  }
  func.func @transform_2(%arg0: i32) -> (i32, i32) {
    %c0_i32 = arith.constant 0 : i32
    %c0_i32_0 = arith.constant 0 : i32
    return %c0_i32, %arg0 : i32, i32
  }
}

</mosaic_0001>

<bundles_post_ra>
// kernel: tpu_custom_call.1
= control target key start
LH: loop header
LB: loop body
LE: loop exit
PB: predicated region body
PF: predicated region fallthrough
CT: control target
= control target key end

     0   :  { %7 = vsyncpa [#allocation3], 0  ;;  %s6495_s0 = inlined_call_operand.hbm [shape: f32[8,228], index: 0, kind: input, shape index: {}]   ;;  %s6496_s1 = inlined_call_operand.hbm [shape: s32[1,4352], index: 1, kind: input, shape index: {}]   ;;  %s6497_s2 = inlined_call_operand.hbm [shape: f32[8,4352], index: 2, kind: output, shape index: {}]  }
   0x1   :  { %8 = vsyncpa [#allocation6], 0 }
   0x2   :  { %10 = vsyncpa [#allocation6 + $0x1], 0 }
   0x3   :  { %11 = vsyncpa [#allocation4], 0 }
   0x4   :  { %13 = vsyncpa [#allocation4 + $0x1], 0  ;;  %s4279_s9 = smov 0   ;;  %s4281_s10 = smov 0  }
   0x5   :  { %s4283_s11 = smov 0   ;;  %s4285_s12 = smov 0  }
   0x6 LB: > { %s4300_s13 = sadd.s32 4294967295, %s4256_s12   ;;  %s2565_s14 = sadd.s32 4294967294, %s4256_s12   ;;  %s4256_s12 = sphi %s4285_s12, %s6702_s12   ;;  %s4252_s11 = sphi %s4283_s11, %s6701_s11   ;;  %s4248_s10 = sphi %s4281_s10, %s6700_s10   ;;  %s4244_s9 = sphi %s4279_s9, %s6699_s9  }
   0x7   : > { %p60_p0 = scmp.ne.s32.totalorder %s4248_s10, %s4244_s9  ;;  %p6498_p1 = scmp.eq.s32.totalorder %s4300_s13, 0 }
   0x8   : > { %p90_p3 = scmp.eq.s32.totalorder %s2565_s14, 1  ;;  %p2566_p5 = scmp.ge.s32.totalorder %s4256_s12, 1 }
   0x9   : > { %p4309_p4 = por %p6498_p1, %p60_p0  ;;  %p97_p7 = scmp.lt.s32.totalorder %s4256_s12, 3 }
   0xa   : > { %p4314_p6 = por %p90_p3, %p60_p0  ;;  %s4258_s18 = smov [#allocation2]  }
   0xb   : > { %s6503_s15 = scalar_select %p4309_p4, 1, 0 }
   0xc   : > { %s6504_s16 = scalar_select %p4314_p6, 1, 0 }
   0xd   : > { %p4319_p8 = pnand %p2566_p5, %p97_p7  ;;  %s110_s19 = sshll.u32 %s4258_s18, 4  ;;  %s111_s19 = int_to_ptr.vmem [resolvable:$true] %s110_s19 }
   0xe   : > { %s4327_s20 = sadd.s32 1, %s4256_s12   ;;  %s47_s24 = sadd.s32 1, %s4252_s11 }
   0xf   : > { %s6505_s17 = scalar_select %p4319_p8, 1, 0 }
  0x10   : > { %p4074_p10 = pneg %p4319_p8  ;;  %s44_s22 = ssub.s32 %s4256_s12, %s4327_s20 }
  0x11   : > { %p4337_p12 = scmp.eq.s32.totalorder %s44_s22, 0  ;;  %s4128_s27 = scalar_lea.hbm %s6495_s0, 256 }
  0x12   : > { %p4331_p11 = pnand %p4074_p10, %p6498_p1  ;;  %p4129_p0 = scmp.ne.s32.totalorder %s6495_s0, %s4128_s27 }
  0x13   : > { %s6507_s23 = scalar_select %p4337_p12, 1, 0 }
  0x14   : > { %p4130_p3 = pneg %p4331_p11  ;;  %p4135_p10 = scmp.lt.u32.totalorder %s4128_s27, %s6495_s0 }
  0x16   : > { %p4131_p5 = pnand %p4130_p3, %p4129_p0 }
  0x18   : > { %p4132_p7 = pneg %p4131_p5 }
  0x1a   : > { %p4137_p9 = pnand %p4135_p10, %p4132_p7 }
  0x1c   : > { %4140 = shalt.err (!%p4137_p9)
}
  0x1d   : > { %s4141_s4 = scalar_lea.vmem %s111_s19, 256  ;;  %p4149_p6 = scmp.lt.s32.totalorder %s111_s19, %s111_s19 }
  0x1e   : > { %p4142_p1 = scmp.ne.s32.totalorder %s111_s19, %s4141_s4  ;;  %p4150_p4 = scmp.lt.s32.totalorder %s4141_s4, %s4141_s4 }
  0x20   : > { %p4144_p2 = pnand %p4142_p1, %p4130_p3  ;;  %p4151_p8 = por %p4150_p4, %p4149_p6 }
  0x22   : > { %p4145_p13 = pneg %p4144_p2 }
  0x24   : > { %p4152_p12 = pnand %p4151_p8, %p4145_p13 }
  0x26   : > { %4155 = shalt.err (!%p4152_p12)
}
  0x27   : > { %4077 = dma.hbm_to_vmem [thread:$0]  (!%p4331_p11), %s6495_s0, 256, %s111_s19, [#allocation3]  }
  0x28   : > { %p6508_p1 = scmp.ne.s32.totalorder %s6507_s23, 0  ;;  %p55_p2 = scmp.eq.s32.totalorder %s4256_s12, 0 }
  0x29   : > { %p6509_p4 = scmp.ne.s32.totalorder %s4252_s11, %s4248_s10  ;;  %p6510_p6 = scmp.eq.s32.totalorder %s4300_s13, 1 }
  0x2a   : > { %s4363_s7 = scalar_select %p6508_p1, %s4252_s11, %s47_s24  }
  0x2b   : > { %p4371_p8 = por %p6510_p6, %p6509_p4  ;;  %p4087_p9 = scmp.lt.s32.totalorder %s4256_s12, 2 }
  0x2c   : > { %s121_s14 = sand.u32 1, %s4252_s11   ;;  %p6512_p12 = pmov %p6509_p4 }
  0x2d   : > { %s4063_s18 = smul.u32 17, %s121_s14  ;;  %s122_s27 = scalar_lea.sflag [#allocation6], %s121_s14 }
  0x2e   : > { %p56_p13 = por %p55_p2, %p6512_p12  ;;  %s3571_s21 = smul.u32 272, %s4256_s12 }
  0x2f   : > { %s125_s25 = scalar_lea.vmem [#allocation5], %s4063_s18  ;;  %s4161_s3 = scalar_lea.hbm %s6496_s1, 544 }
  0x30   : > { %p4381_p0 = pnand %p4087_p9, %p56_p13  ;;  %s4388_s24 = scalar_lea.hbm %s6496_s1, %s3571_s21 }
  0x31   : > { %s133_s26 = sshll.u32 %s125_s25, 4  ;;  %s4156_s28 = scalar_lea.hbm %s4388_s24, 272  ;;  %s4390_s26 = int_to_ptr.vmem [resolvable:$true] %s133_s26 }
  0x32   : > { %p4157_p11 = scmp.ne.s32.totalorder %s4388_s24, %s4156_s28  ;;  %p4158_p3 = pneg %p4381_p0 }
  0x33   : > { %p4162_p10 = scmp.lt.u32.totalorder %s4388_s24, %s6496_s1  ;;  %p4163_p1 = scmp.lt.u32.totalorder %s4161_s3, %s4156_s28 }
  0x34   : > { %p4159_p5 = pnand %p4158_p3, %p4157_p11  ;;  %p4165_p4 = scmp.lt.u32.totalorder %s4156_s28, %s4388_s24 }
  0x35   : > { %p4164_p2 = por %p4163_p1, %p4162_p10 }
  0x36   : > { %p4160_p7 = pneg %p4159_p5 }
  0x37   : > { %p4166_p6 = por %p4165_p4, %p4164_p2 }
  0x39   : > { %p4167_p9 = pnand %p4166_p6, %p4160_p7 }
  0x3b   : > { %4170 = shalt.err (!%p4167_p9)
}
  0x3c   : > { %s4171_s6 = scalar_lea.vmem %s4390_s26, 272  ;;  %s4259_s14 = smov [#allocation5]  }
  0x3d   : > { %p4172_p12 = scmp.ne.s32.totalorder %s4390_s26, %s4171_s6  ;;  %s4176_s18 = sshll.u32 %s4259_s14, 4  ;;  %s4177_s18 = int_to_ptr.vmem [resolvable:$false] %s4176_s18 }
  0x3e   : > { %s4178_s21 = scalar_lea.vmem %s4177_s18, 544  ;;  %p4179_p5 = scmp.lt.s32.totalorder %s4390_s26, %s4177_s18 }
  0x3f   : > { %p4174_p13 = pnand %p4172_p12, %p4158_p3  ;;  %p4180_p10 = scmp.lt.s32.totalorder %s4178_s21, %s4171_s6 }
  0x41   : > { %p4175_p11 = pneg %p4174_p13  ;;  %p4181_p1 = por %p4180_p10, %p4179_p5 }
  0x43   : > { %p4182_p2 = pnand %p4181_p1, %p4175_p11 }
  0x45   : > { %4185 = shalt.err (!%p4182_p2)
}
  0x46   : > { %4081 = dma.hbm_to_vmem [thread:$0]  (!%p4381_p0), %s4388_s24, 272, %s4390_s26, %s122_s27  }
  0x47   : > { %p6514_p7 = scmp.ne.s32.totalorder %s6505_s17, 0 }
  0x48   : > { %p6515_p3 = scmp.eq.s32.totalorder (!%p6514_p7), %s4300_s13, 0 }
  0x49   : > { %142 = sbr.rel (%p6514_p7) target bundleno = 612 (0x264), region = 28 }
  0x50   : > { %4231 = dma.done.wait (%p6515_p3), [#allocation3], 256   ;;  %p6516_p4 = pmov %p6515_p3 }
  0x51   : > { %s4424_s19 = sand.u32 1, %s4248_s10   ;;  %p6517_p0 = scmp.ne.s32.totalorder %s6503_s15, 0 }
  0x52   : > { %4233 = vsyncadd (%p6516_p4), [#allocation3], 4294967040  ;;  %s4064_s23 = smul.u32 17, %s4424_s19  ;;  %s149_s22 = scalar_lea.sflag [#allocation6], %s4424_s19 }
  0x54   : > { %s4428_s25 = scalar_lea.vmem [#allocation5], %s4064_s23 }
  0x55   : > { %4235 = dma.done.wait (%p6517_p0), %s149_s22, 272  }
  0x56   : > { %4237 = vsyncadd (%p6517_p0), %s149_s22, 4294967024  ;;  %v178_v0 = vlaneseq  ;;  %vm6501_vm0 = vcmask 818176   ;;  %v4442_v5 = vld [vmem:[%s4428_s25] sm:$0xff]  ;;  %v4260_v13 = vmov 1.0|1.0   ;;  %v4261_v56 = vmov 0.0  }
  0x57   : > { %v4450_v8 = vld [vmem:[#allocation2 + $0x8] sm:$0xff]  ;;  %v6542_v60 = vmov 0  ;;  %v4909_v61 = vld [vmem:[#allocation2] sm:$0xff]  ;;  %v6556_v40 = vmov 0  ;;  %v6563_v41 = vmov 0  ;;  %v6567_v44 = vmov 0 }
  0x58   : > { %v4434_v1 = vshrl.u32 %v178_v0, 7  ;;  %3124 = vmatprep.mubr.msk.f32.mxu0 %vm6501_vm0, %v4450_v8  ;;  %3183 = vmatprep.mubr.msk.f32.mxu1 %vm6501_vm0, %v4450_v8  ;;  %v6570_v45 = vmov 0  ;;  %v6573_v48 = vmov 0  ;;  %v5247_v49 = vld [vmem:[%s4428_s25 + $0x8] sm:$0xff]  ;;  %v6576_v53 = vmov 0  ;;  %s4065_s15 = smul.u32 136, %s4424_s19 }
  0x59   : > { %s3572_s24 = smul.u32 2176, %s4300_s13  ;;  %s2469_s30 = scalar_lea.sflag [#allocation4], %s4424_s19 }
  0x5a   : > { %v214_v2 = vsub.s32 1, %v4434_v1  ;;  %v210_v3 = vsub.s32 0, %v4434_v1  ;;  %v4439_v4 = vadd.s32 8, %v4434_v1  ;;  %v4445_v6 = vadd.s32 16, %v4434_v1  ;;  %s6401_s17 = scalar_lea.vmem [#allocation7], %s4065_s15  ;;  %s4263_s13 = smov [#allocation7]  }
  0x5b   : > { %v4448_v7 = vadd.s32 24, %v4434_v1  ;;  %v4463_v11 = vadd.s32 32, %v4434_v1  ;;  %v4466_v12 = vadd.s32 40, %v4434_v1  ;;  %v4494_v14 = vadd.s32 48, %v4434_v1  ;;  %s2483_s26 = sshll.u32 %s6401_s17, 4  ;;  %s6450_s29 = scalar_lea.hbm %s6497_s2, %s3572_s24  ;;  %s6452_s26 = int_to_ptr.vmem [resolvable:$true] %s2483_s26 }
  0x5c   : > { %v4455_v9 = vrot.slane %v4442_v5, %v214_v2  ;;  %v4460_v10 = vrot.slane %v4442_v5, %v210_v3  ;;  %v4497_v15 = vadd.s32 56, %v4434_v1  ;;  %v4510_v16 = vadd.s32 64, %v4434_v1  ;;  %s4186_s3 = scalar_lea.vmem %s6452_s26, 2176  ;;  %s4190_s4 = sshll.u32 %s4263_s13, 4  ;;  %s4191_s4 = int_to_ptr.vmem [resolvable:$false] %s4190_s4 }
  0x5d   : > { %v4513_v17 = vadd.s32 72, %v4434_v1  ;;  %v4526_v18 = vadd.s32 80, %v4434_v1  ;;  %v4529_v19 = vadd.s32 88, %v4434_v1  ;;  %v4542_v20 = vadd.s32 96, %v4434_v1  ;;  %p4187_p6 = scmp.ne.s32.totalorder %s6452_s26, %s4186_s3  ;;  %s4192_s5 = scalar_lea.vmem %s4191_s4, 4352 }
  0x5e   : > { %vm277_vm1 = vcmp.eq.s32.totalorder %v4434_v1, %v4455_v9  ;;  %vm294_vm2 = vcmp.eq.s32.totalorder %v4439_v4, %v4455_v9  ;;  %vm276_vm3 = vcmp.eq.s32.totalorder %v4434_v1, %v4460_v10  ;;  %vm293_vm4 = vcmp.eq.s32.totalorder %v4439_v4, %v4460_v10  ;;  %p4193_p13 = scmp.lt.s32.totalorder %s6452_s26, %s4191_s4  ;;  %p4194_p11 = scmp.lt.s32.totalorder %s4192_s5, %s4186_s3 }
  0x5f   : > { %vm3573_vm5 = vmpackc.low %vm294_vm2, %vm277_vm1  ;;  %vm311_vm6 = vcmp.eq.s32.totalorder %v4445_v6, %v4455_v9  ;;  %vm328_vm7 = vcmp.eq.s32.totalorder %v4448_v7, %v4455_v9  ;;  %vm310_vm8 = vcmp.eq.s32.totalorder %v4445_v6, %v4460_v10  ;;  %vm327_vm9 = vcmp.eq.s32.totalorder %v4448_v7, %v4460_v10  ;;  %p4188_p9 = pnand %p4187_p6, %p4371_p8 }
  0x60   : > { %3574 = vmatprep.subr.msk.bf16.mxu0 %vm3573_vm5, %v4260_v13  ;;  %vm3575_vm10 = vmpackc.low %vm293_vm4, %vm276_vm3  ;;  %vm345_vm11 = vcmp.eq.s32.totalorder %v4463_v11, %v4455_v9  ;;  %vm362_vm12 = vcmp.eq.s32.totalorder %v4466_v12, %v4455_v9  ;;  %vm344_vm1 = vcmp.eq.s32.totalorder %v4463_v11, %v4460_v10  ;;  %vm361_vm2 = vcmp.eq.s32.totalorder %v4466_v12, %v4460_v10  ;;  %p4195_p5 = por %p4194_p11, %p4193_p13 }
  0x61   : > { %3576 = vmatpush1.bf16.msk.msra.mxu0 %vm3575_vm10, %v4260_v13  ;;  %vm3577_vm13 = vmpackc.low %vm328_vm7, %vm311_vm6  ;;  %vm379_vm3 = vcmp.eq.s32.totalorder %v4494_v14, %v4455_v9  ;;  %vm396_vm4 = vcmp.eq.s32.totalorder %v4497_v15, %v4455_v9  ;;  %vm378_vm7 = vcmp.eq.s32.totalorder %v4494_v14, %v4460_v10  ;;  %vm430_vm10 = vcmp.eq.s32.totalorder %v4513_v17, %v4455_v9  ;;  %p4189_p12 = pneg %p4188_p9 }
  0x62   : > { %3578 = vmatprep.subr.msk.bf16.mxu0 %vm3577_vm13, %v4260_v13  ;;  %vm3579_vm14 = vmpackc.low %vm327_vm9, %vm310_vm8  ;;  %vm395_vm8 = vcmp.eq.s32.totalorder %v4497_v15, %v4460_v10  ;;  %vm413_vm9 = vcmp.eq.s32.totalorder %v4510_v16, %v4455_v9  ;;  %vm412_vm13 = vcmp.eq.s32.totalorder %v4510_v16, %v4460_v10  ;;  %v4545_v21 = vadd.s32 104, %v4434_v1 }
  0x63   : > { %vm3581_vm15 = vmpackc.low %vm362_vm12, %vm345_vm11  ;;  %v4554_v22 = vadd.s32 112, %v4434_v1  ;;  %v4561_v23 = vadd.s32 120, %v4434_v1  ;;  %v222_v24 = vsub.s32 3, %v4434_v1  ;;  %v218_v25 = vsub.s32 2, %v4434_v1  ;;  %p4196_p10 = pnand %p4195_p5, %p4189_p12 }
  0x64   : > { %vm3583_vm5 = vmpackc.low %vm361_vm2, %vm344_vm1  ;;  %vm464_vm1 = vcmp.eq.s32.totalorder %v4529_v19, %v4455_v9  ;;  %v4572_v26 = vadd.s32 128, %v4434_v1  ;;  %v4575_v27 = vadd.s32 136, %v4434_v1  ;;  %v4602_v30 = vadd.s32 144, %v4434_v1 }
  0x65   : > { %3580 = vmatpush1.bf16.msk.msra.mxu0 %vm3579_vm14, %v4260_v13  ;;  %vm3585_vm6 = vmpackc.low %vm396_vm4, %vm379_vm3  ;;  %vm429_vm14 = vcmp.eq.s32.totalorder %v4513_v17, %v4460_v10  ;;  %vm446_vm4 = vcmp.eq.s32.totalorder %v4526_v18, %v4460_v10  ;;  %v4584_v28 = vrot.slane %v4442_v5, %v222_v24  ;;  %v4590_v29 = vrot.slane %v4442_v5, %v218_v25 }
  0x66   : > { %3582 = vmatprep.subr.msk.bf16.mxu0 %vm3581_vm15, %v4260_v13  ;;  %vm3587_vm11 = vmpackc.low %vm395_vm8, %vm378_vm7  ;;  %vm447_vm15 = vcmp.eq.s32.totalorder %v4526_v18, %v4455_v9  ;;  %vm498_vm7 = vcmp.eq.s32.totalorder %v4545_v21, %v4455_v9  ;;  %v4605_v31 = vadd.s32 152, %v4434_v1  ;;  %v4634_v34 = vadd.s32 160, %v4434_v1 }
  0x67   : > { %vm3589_vm12 = vmpackc.low %vm430_vm10, %vm413_vm9  ;;  %vm480_vm10 = vcmp.eq.s32.totalorder %v4542_v20, %v4460_v10  ;;  %v4637_v35 = vadd.s32 168, %v4434_v1  ;;  %v4675_v38 = vadd.s32 176, %v4434_v1  ;;  %v4678_v39 = vadd.s32 184, %v4434_v1 }
  0x68   : > { %vm3591_vm2 = vmpackc.low %vm429_vm14, %vm412_vm13  ;;  %vm532_vm13 = vcmp.eq.s32.totalorder %v4561_v23, %v4455_v9  ;;  %v4719_v42 = vadd.s32 192, %v4434_v1  ;;  %v4722_v43 = vadd.s32 200, %v4434_v1  ;;  %v4763_v46 = vadd.s32 208, %v4434_v1 }
  0x69   : > { %3584 = vmatpush1.bf16.msk.msra.mxu0 %vm3583_vm5, %v4260_v13  ;;  %vm3593_vm3 = vmpackc.low %vm464_vm1, %vm447_vm15  ;;  %vm463_vm5 = vcmp.eq.s32.totalorder %v4529_v19, %v4460_v10  ;;  %vm514_vm15 = vcmp.eq.s32.totalorder %v4554_v22, %v4460_v10  ;;  %vm531_vm1 = vcmp.eq.s32.totalorder %v4561_v23, %v4460_v10  ;;  %v4766_v47 = vadd.s32 216, %v4434_v1 }
  0x6a   : > { %3586 = vmatprep.subr.msk.bf16.mxu0 %vm3585_vm6, %v4260_v13  ;;  %vm481_vm6 = vcmp.eq.s32.totalorder %v4542_v20, %v4455_v9  ;;  %vm3595_vm8 = vmpackc.low %vm463_vm5, %vm446_vm4  ;;  %vm566_vm4 = vcmp.eq.s32.totalorder %v4575_v27, %v4455_v9  ;;  %vm279_vm5 = vcmp.eq.s32.totalorder %v4434_v1, %v4584_v28  ;;  %v230_v50 = vsub.s32 5, %v4434_v1 }
  0x6b   : > { %vm3597_vm9 = vmpackc.low %vm498_vm7, %vm481_vm6  ;;  %vm296_vm6 = vcmp.eq.s32.totalorder %v4439_v4, %v4584_v28  ;;  %v226_v51 = vsub.s32 4, %v4434_v1  ;;  %v4812_v52 = vadd.s32 224, %v4434_v1  ;;  %v234_v32 = vsub.s32 6, %v4434_v1 }
  0x6c   : > { %vm4612_vm7 = vmpackc.low %vm531_vm1, %vm514_vm15  ;;  %v4840_v54 = vrot.slane %v4442_v5, %v230_v50  ;;  %v5298_v58 = vrot.slane %v5247_v49, %v210_v3  ;;  %v5515_v33 = vrot.slane %v5247_v49, %v218_v25  ;;  %v5781_v62 = vrot.slane %v5247_v49, %v230_v50 }
  0x6d   : > { %3588 = vmatpush1.bf16.msk.msra.mxu0 %vm3587_vm11, %v4260_v13  ;;  %vm497_vm11 = vcmp.eq.s32.totalorder %v4545_v21, %v4460_v10  ;;  %vm3629_vm15 = vmpackc.low %vm296_vm6, %vm279_vm5  ;;  %vm312_vm5 = vcmp.eq.s32.totalorder %v4445_v6, %v4590_v29  ;;  %vm329_vm6 = vcmp.eq.s32.totalorder %v4448_v7, %v4590_v29  ;;  %v4849_v55 = vrot.slane %v4442_v5, %v226_v51 }
  0x6e   : > { %3590 = vmatprep.subr.msk.bf16.mxu0 %vm3589_vm12, %v4260_v13  ;;  %vm515_vm12 = vcmp.eq.s32.totalorder %v4554_v22, %v4455_v9  ;;  %vm3599_vm14 = vmpackc.low %vm497_vm11, %vm480_vm10  ;;  %vm548_vm11 = vcmp.eq.s32.totalorder %v4572_v26, %v4460_v10  ;;  %3630 = vmatprep.subr.msk.bf16.mxu1 %vm3629_vm15, %v4260_v13  ;;  %vm364_vm15 = vcmp.eq.s32.totalorder %v4466_v12, %v4584_v28 }
  0x6f   : > { %v5080_v37 = vrot.slane %v4442_v5, %v234_v32  ;;  %v5793_v63 = vrot.slane %v5247_v49, %v226_v51  ;;  %v6642_v51 = vmov 0  ;;  %v5979_v0 = vrot.slane %v5247_v49, %v234_v32 }
  0x71   : > { %3592 = vmatpush1.bf16.msk.msra.mxu0 %vm3591_vm2, %v4260_v13  ;;  %vm3601_vm2 = vmpackc.low %vm532_vm13, %vm515_vm12  ;;  %vm565_vm12 = vcmp.eq.s32.totalorder %v4575_v27, %v4460_v10  ;;  %vm583_vm13 = vcmp.eq.s32.totalorder %v4602_v30, %v4455_v9 }
  0x72   : > { %3594 = vmatprep.subr.msk.bf16.mxu0 %vm3593_vm3, %v4260_v13  ;;  %vm549_vm3 = vcmp.eq.s32.totalorder %v4572_v26, %v4455_v9 }
  0x73   : > { %vm4621_vm10 = vmpackc.low %vm566_vm4, %vm549_vm3  ;;  %vm330_vm3 = vcmp.eq.s32.totalorder %v4448_v7, %v4584_v28 }
  0x74   : > { %vm4647_vm4 = vmpackc.low %vm565_vm12, %vm548_vm11  ;;  %vm617_vm11 = vcmp.eq.s32.totalorder %v4634_v34, %v4455_v9  ;;  %vm634_vm12 = vcmp.eq.s32.totalorder %v4637_v35, %v4455_v9 }
  0x75   : > { %3596 = vmatpush1.bf16.msk.msra.mxu0 %vm3595_vm8, %v4260_v13  ;;  %vm278_vm8 = vcmp.eq.s32.totalorder %v4434_v1, %v4590_v29 }
  0x76   : > { %3598 = vmatprep.subr.msk.bf16.mxu0 %vm3597_vm9, %v4260_v13  ;;  %vm295_vm9 = vcmp.eq.s32.totalorder %v4439_v4, %v4590_v29 }
  0x77   : > { %vm3631_vm1 = vmpackc.low %vm295_vm9, %vm278_vm8  ;;  %vm582_vm8 = vcmp.eq.s32.totalorder %v4602_v30, %v4460_v10  ;;  %vm599_vm9 = vcmp.eq.s32.totalorder %v4605_v31, %v4460_v10 }
  0x78   : > { %3632 = vmatpush1.bf16.msk.msra.mxu1 %vm3631_vm1, %v4260_v13  ;;  %vm4691_vm1 = vmpackc.low %vm599_vm9, %vm582_vm8  ;;  %vm651_vm8 = vcmp.eq.s32.totalorder %v4675_v38, %v4455_v9  ;;  %vm668_vm9 = vcmp.eq.s32.totalorder %v4678_v39, %v4455_v9 }
  0x79   : > { %3600 = vmatpush1.bf16.msk.msra.mxu0 %vm3599_vm14, %v4260_v13  ;;  %vm600_vm14 = vcmp.eq.s32.totalorder %v4605_v31, %v4455_v9 }
  0x7a   : > { %3602 = vmatprep.subr.msk.bf16.mxu0 %vm3601_vm2, %v4260_v13  ;;  %vm313_vm2 = vcmp.eq.s32.totalorder %v4445_v6, %v4584_v28 }
  0x7d   : > { %3604 = vmatpush1.bf16.msk.msra.mxu0 %vm4612_vm7, %v4260_v13  ;;  %vm4662_vm7 = vmpackc.low %vm600_vm14, %vm583_vm13  ;;  %vm347_vm14 = vcmp.eq.s32.totalorder %v4463_v11, %v4584_v28 }
  0x7e   : > { %3606 = vmatprep.subr.msk.bf16.mxu0 %vm4621_vm10, %v4260_v13  ;;  %vm3633_vm10 = vmpackc.low %vm330_vm3, %vm313_vm2  ;;  %vm346_vm2 = vcmp.eq.s32.totalorder %v4463_v11, %v4590_v29  ;;  %vm363_vm3 = vcmp.eq.s32.totalorder %v4466_v12, %v4590_v29 }
  0x7f   : > { %3634 = vmatprep.subr.msk.bf16.mxu1 %vm3633_vm10, %v4260_v13  ;;  %vm3635_vm13 = vmpackc.low %vm329_vm6, %vm312_vm5  ;;  %vm616_vm5 = vcmp.eq.s32.totalorder %v4634_v34, %v4460_v10  ;;  %vm633_vm6 = vcmp.eq.s32.totalorder %v4637_v35, %v4460_v10  ;;  %vm398_vm10 = vcmp.eq.s32.totalorder %v4497_v15, %v4584_v28 }
  0x80   : > { %3636 = vmatpush1.bf16.msk.msra.mxu1 %vm3635_vm13, %v4260_v13  ;;  %vm4735_vm13 = vmpackc.low %vm633_vm6, %vm616_vm5  ;;  %vm685_vm5 = vcmp.eq.s32.totalorder %v4719_v42, %v4455_v9  ;;  %vm702_vm6 = vcmp.eq.s32.totalorder %v4722_v43, %v4455_v9 }
  0x81   : > { %3608 = vmatpush1.bf16.msk.msra.mxu0 %vm4647_vm4, %v4260_v13  ;;  %vm4706_vm4 = vmpackc.low %vm634_vm12, %vm617_vm11  ;;  %vm381_vm12 = vcmp.eq.s32.totalorder %v4494_v14, %v4584_v28 }
  0x82   : > { %3610 = vmatprep.subr.msk.bf16.mxu0 %vm4662_vm7, %v4260_v13  ;;  %vm3637_vm7 = vmpackc.low %vm364_vm15, %vm347_vm14  ;;  %vm380_vm14 = vcmp.eq.s32.totalorder %v4494_v14, %v4590_v29  ;;  %vm397_vm15 = vcmp.eq.s32.totalorder %v4497_v15, %v4590_v29 }
  0x83   : > { %3638 = vmatprep.subr.msk.bf16.mxu1 %vm3637_vm7, %v4260_v13  ;;  %vm3639_vm11 = vmpackc.low %vm363_vm3, %vm346_vm2  ;;  %vm650_vm2 = vcmp.eq.s32.totalorder %v4675_v38, %v4460_v10  ;;  %vm667_vm3 = vcmp.eq.s32.totalorder %v4678_v39, %v4460_v10  ;;  %vm432_vm7 = vcmp.eq.s32.totalorder %v4513_v17, %v4584_v28 }
  0x84   : > { %3640 = vmatpush1.bf16.msk.msra.mxu1 %vm3639_vm11, %v4260_v13  ;;  %vm4779_vm11 = vmpackc.low %vm667_vm3, %vm650_vm2  ;;  %vm719_vm2 = vcmp.eq.s32.totalorder %v4763_v46, %v4455_v9 }
  0x85   : > { %3612 = vmatpush1.bf16.msk.msra.mxu0 %vm4691_vm1, %v4260_v13  ;;  %vm4750_vm1 = vmpackc.low %vm668_vm9, %vm651_vm8  ;;  %vm415_vm9 = vcmp.eq.s32.totalorder %v4510_v16, %v4584_v28 }
  0x86   : > { %3614 = vmatprep.subr.msk.bf16.mxu0 %vm4706_vm4, %v4260_v13  ;;  %vm3641_vm4 = vmpackc.low %vm398_vm10, %vm381_vm12  ;;  %vm414_vm12 = vcmp.eq.s32.totalorder %v4510_v16, %v4590_v29  ;;  %vm431_vm10 = vcmp.eq.s32.totalorder %v4513_v17, %v4590_v29 }
  0x87   : > { %3642 = vmatprep.subr.msk.bf16.mxu1 %vm3641_vm4, %v4260_v13  ;;  %vm3643_vm8 = vmpackc.low %vm397_vm15, %vm380_vm14  ;;  %vm684_vm14 = vcmp.eq.s32.totalorder %v4719_v42, %v4460_v10  ;;  %vm701_vm15 = vcmp.eq.s32.totalorder %v4722_v43, %v4460_v10  ;;  %vm466_vm4 = vcmp.eq.s32.totalorder %v4529_v19, %v4584_v28 }
  0x88   : > { %3644 = vmatpush1.bf16.msk.msra.mxu1 %vm3643_vm8, %v4260_v13  ;;  %vm3645_vm3 = vmpackc.low %vm432_vm7, %vm415_vm9  ;;  %vm448_vm9 = vcmp.eq.s32.totalorder %v4526_v18, %v4590_v29  ;;  %vm465_vm7 = vcmp.eq.s32.totalorder %v4529_v19, %v4590_v29 }
  0x89   : > { %3616 = vmatpush1.bf16.msk.msra.mxu0 %vm4735_vm13, %v4260_v13  ;;  %vm4794_vm13 = vmpackc.low %vm702_vm6, %vm685_vm5  ;;  %3646 = vmatprep.subr.msk.bf16.mxu1 %vm3645_vm3, %v4260_v13  ;;  %vm449_vm6 = vcmp.eq.s32.totalorder %v4526_v18, %v4584_v28  ;;  %vm482_vm3 = vcmp.eq.s32.totalorder %v4542_v20, %v4590_v29 }
  0x8a   : > { %3618 = vmatprep.subr.msk.bf16.mxu0 %vm4750_vm1, %v4260_v13  ;;  %vm736_vm1 = vcmp.eq.s32.totalorder %v4766_v47, %v4455_v9  ;;  %vm3647_vm5 = vmpackc.low %vm431_vm10, %vm414_vm12  ;;  %vm718_vm12 = vcmp.eq.s32.totalorder %v4763_v46, %v4460_v10  ;;  %vm735_vm10 = vcmp.eq.s32.totalorder %v4766_v47, %v4460_v10 }
  0x8b   : > { %vm4822_vm8 = vmpackc.low %vm701_vm15, %vm684_vm14  ;;  %vm753_vm14 = vcmp.eq.s32.totalorder %v4812_v52, %v4455_v9  ;;  %v5502_v9 = vrot.slane %v5247_v49, %v222_v24 }
  0x8c   : > { %3648 = vmatpush1.bf16.msk.msra.mxu1 %vm3647_vm5, %v4260_v13  ;;  %vm3651_vm15 = vmpackc.low %vm465_vm7, %vm448_vm9  ;;  %vm499_vm5 = vcmp.eq.s32.totalorder %v4545_v21, %v4590_v29  ;;  %vm281_vm9 = vcmp.eq.s32.totalorder %v4434_v1, %v4840_v54  ;;  %vm298_vm7 = vcmp.eq.s32.totalorder %v4439_v4, %v4840_v54  ;;  %v3050_v57 = vsel %vm753_vm14, 1.0, %v4261_v56 }
  0x8d   : > { %3620 = vmatpush1.bf16.msk.msra.mxu0 %vm4779_vm11, %v4260_v13  ;;  %vm3625_vm11 = vmpackc.low %vm736_vm1, %vm719_vm2  ;;  %vm483_vm2 = vcmp.eq.s32.totalorder %v4542_v20, %v4584_v28  ;;  %vm500_vm1 = vcmp.eq.s32.totalorder %v4545_v21, %v4584_v28  ;;  %vm517_vm14 = vcmp.eq.s32.totalorder %v4554_v22, %v4584_v28 }
  0x8e   : > { %3622 = vmatprep.subr.msk.bf16.mxu0 %vm4794_vm13, %v4260_v13  ;;  %vm3649_vm13 = vmpackc.low %vm466_vm4, %vm449_vm6  ;;  %vm6502_vm4 = vcmask 1043456  }
  0x8f   : > { %3650 = vmatprep.subr.msk.bf16.mxu1 %vm3649_vm13, %v4260_v13  ;;  %vm3627_vm6 = vmpackc.low %vm735_vm10, %vm718_vm12  ;;  %vm280_vm13 = vcmp.eq.s32.totalorder %v4434_v1, %v4849_v55 }
  0x90   : > { %3652 = vmatpush1.bf16.msk.msra.mxu1 %vm3651_vm15, %v4260_v13  ;;  %vm3653_vm12 = vmpackc.low %vm500_vm1, %vm483_vm2  ;;  %vm534_vm15 = vcmp.eq.s32.totalorder %v4561_v23, %v4584_v28  ;;  %vm516_vm2 = vcmp.eq.s32.totalorder %v4554_v22, %v4590_v29  ;;  %vm533_vm1 = vcmp.eq.s32.totalorder %v4561_v23, %v4590_v29 }
  0x91   : > { %3624 = vmatpush1.bf16.msk.msra.mxu0 %vm4822_vm8, %v4260_v13  ;;  %vm752_vm8 = vcmp.eq.s32.totalorder %v4812_v52, %v4460_v10  ;;  %3654 = vmatprep.subr.msk.bf16.mxu1 %vm3653_vm12, %v4260_v13  ;;  %vm3655_vm10 = vmpackc.low %vm499_vm5, %vm482_vm3  ;;  %vm315_vm5 = vcmp.eq.s32.totalorder %v4445_v6, %v4840_v54  ;;  %vm568_vm12 = vcmp.eq.s32.totalorder %v4575_v27, %v4584_v28  ;;  %v238_v10 = vsub.s32 7, %v4434_v1 }
  0x92   : > { %3626 = vmatprep.subr.msk.bf16.mxu0 %vm3625_vm11, %v4260_v13  ;;  %vm297_vm11 = vcmp.eq.s32.totalorder %v4439_v4, %v4849_v55  ;;  %vm4890_vm0 = vmpackc.low %vm298_vm7, %vm281_vm9  ;;  %v3049_v59 = vsel %vm752_vm8, 1.0, %v4261_v56  ;;  %vm314_vm9 = vcmp.eq.s32.totalorder %v4445_v6, %v4849_v55  ;;  %vm331_vm7 = vcmp.eq.s32.totalorder %v4448_v7, %v4849_v55 }
  0x93   : > { %vm4901_vm3 = vmpackc.low %vm297_vm11, %vm280_vm13  ;;  %vm551_vm11 = vcmp.eq.s32.totalorder %v4572_v26, %v4584_v28  ;;  %v5070_v36 = vrot.slane %v4442_v5, %v238_v10 }
  0x94   : > { %3656 = vmatpush1.bf16.msk.msra.mxu1 %vm3655_vm10, %v4260_v13  ;;  %v6543_v60 = vsel %vm4901_vm3, 4294967295, %v6542_v60  ;;  %vm3657_vm8 = vmpackc.low %vm534_vm15, %vm517_vm14  ;;  %vm550_vm3 = vcmp.eq.s32.totalorder %v4572_v26, %v4590_v29  ;;  %vm567_vm14 = vcmp.eq.s32.totalorder %v4575_v27, %v4590_v29 }
  0x95   : > { %3628 = vmatpush1.bf16.msk.msra.mxu0 %vm3627_vm6, %v4260_v13  ;;  %vm332_vm6 = vcmp.eq.s32.totalorder %v4448_v7, %v4840_v54  ;;  %3658 = vmatprep.subr.msk.bf16.mxu1 %vm3657_vm8, %v4260_v13  ;;  %vm3659_vm13 = vmpackc.low %vm533_vm1, %vm516_vm2  ;;  %vm349_vm2 = vcmp.eq.s32.totalorder %v4463_v11, %v4840_v54  ;;  %vm366_vm1 = vcmp.eq.s32.totalorder %v4466_v12, %v4840_v54 }
  0x96   : > { %3122 = vmatprep.subr.msk.mxu0 %vm6502_vm4, %v3050_v57  ;;  %vm3689_vm10 = vmpackc.low %vm332_vm6, %vm315_vm5  ;;  %vm6546_vm5 = vnez %v6543_v60  ;;  %vm348_vm6 = vcmp.eq.s32.totalorder %v4463_v11, %v4849_v55  ;;  %v5276_v57 = vrot.slane %v5247_v49, %v214_v2  ;;  %v6625_v2 = vmov 0 }
  0x97   : > { %vm4933_vm15 = vmpackc.low %vm331_vm7, %vm314_vm9  ;;  %vm6547_vm7 = vcmask 818176  }
  0x98   : > { %3660 = vmatpush1.bf16.msk.msra.mxu1 %vm3659_vm13, %v4260_v13  ;;  %vm3661_vm9 = vmpackc.low %vm568_vm12, %vm551_vm11  ;;  %vm585_vm13 = vcmp.eq.s32.totalorder %v4602_v30, %v4584_v28  ;;  %vm584_vm11 = vcmp.eq.s32.totalorder %v4602_v30, %v4590_v29  ;;  %vm601_vm12 = vcmp.eq.s32.totalorder %v4605_v31, %v4590_v29 }
  0x99   : > { %3123 = vmatpush1.msk.msra.mxu0 %vm6502_vm4, %v3049_v59  ;;  %3662 = vmatprep.subr.msk.bf16.mxu1 %vm3661_vm9, %v4260_v13  ;;  %vm3663_vm8 = vmpackc.low %vm567_vm14, %vm550_vm3  ;;  %vm383_vm3 = vcmp.eq.s32.totalorder %v4494_v14, %v4840_v54  ;;  %vm382_vm14 = vcmp.eq.s32.totalorder %v4494_v14, %v4849_v55  ;;  %vm636_vm9 = vcmp.eq.s32.totalorder %v4637_v35, %v4584_v28 }
  0x9a   : > { %1878 = vmatmul.mubr.f32.vlgmr.msra.gmra.mrb[0].mxu0 %v4909_v61  ;;  %3686 = vmatprep.subr.msk.bf16.mxu0 %vm4890_vm0, %v4260_v13  ;;  %vm365_vm0 = vcmp.eq.s32.totalorder %v4466_v12, %v4849_v55  ;;  %vm3693_vm4 = vmpackc.low %vm366_vm1, %vm349_vm2  ;;  %vm399_vm2 = vcmp.eq.s32.totalorder %v4497_v15, %v4849_v55 }
  0x9b   : > { %3688 = vmatpush1.bf16.msk.msra.mxu0 %vm6546_vm5, %v4260_v13  ;;  %3242 = vmatprep.mubr.msk.f32.mxu0 %vm6547_vm7, %v4450_v8  ;;  %vm602_vm5 = vcmp.eq.s32.totalorder %v4605_v31, %v4584_v28  ;;  %vm4964_vm7 = vmpackc.low %vm365_vm0, %vm348_vm6  ;;  %vm619_vm0 = vcmp.eq.s32.totalorder %v4634_v34, %v4584_v28 }
  0x9c   : > { %3690 = vmatprep.subr.msk.bf16.mxu0 %vm3689_vm10, %v4260_v13  ;;  %3664 = vmatpush1.bf16.msk.msra.mxu1 %vm3663_vm8, %v4260_v13  ;;  %vm400_vm10 = vcmp.eq.s32.totalorder %v4497_v15, %v4840_v54  ;;  %vm3665_vm1 = vmpackc.low %vm602_vm5, %vm585_vm13  ;;  %vm635_vm13 = vcmp.eq.s32.totalorder %v4637_v35, %v4590_v29 }
  0x9d   : > { %3666 = vmatprep.subr.msk.bf16.mxu1 %vm3665_vm1, %v4260_v13  ;;  %vm3667_vm6 = vmpackc.low %vm601_vm12, %vm584_vm11  ;;  %vm434_vm11 = vcmp.eq.s32.totalorder %v4513_v17, %v4840_v54  ;;  %vm416_vm12 = vcmp.eq.s32.totalorder %v4510_v16, %v4849_v55  ;;  %vm670_vm1 = vcmp.eq.s32.totalorder %v4678_v39, %v4584_v28 }
  0x9e   : > { %vm3697_vm8 = vmpackc.low %vm400_vm10, %vm383_vm3  ;;  %vm433_vm3 = vcmp.eq.s32.totalorder %v4513_v17, %v4849_v55 }
  0x9f   : > { %3692 = vmatpush1.bf16.msk.msra.mxu0 %vm4933_vm15, %v4260_v13  ;;  %vm618_vm15 = vcmp.eq.s32.totalorder %v4634_v34, %v4590_v29  ;;  %vm4990_vm5 = vmpackc.low %vm399_vm2, %vm382_vm14  ;;  %vm653_vm2 = vcmp.eq.s32.totalorder %v4675_v38, %v4584_v28 }
  0xa0   : > { %3694 = vmatprep.subr.msk.bf16.mxu0 %vm3693_vm4, %v4260_v13  ;;  %3668 = vmatpush1.bf16.msk.msra.mxu1 %vm3667_vm6, %v4260_v13  ;;  %vm417_vm4 = vcmp.eq.s32.totalorder %v4510_v16, %v4840_v54  ;;  %vm3669_vm10 = vmpackc.low %vm636_vm9, %vm619_vm0  ;;  %vm669_vm0 = vcmp.eq.s32.totalorder %v4678_v39, %v4590_v29 }
  0xa1   : > { %3670 = vmatprep.subr.msk.bf16.mxu1 %vm3669_vm10, %v4260_v13  ;;  %vm3671_vm14 = vmpackc.low %vm635_vm13, %vm618_vm15  ;;  %vm468_vm15 = vcmp.eq.s32.totalorder %v4529_v19, %v4840_v54  ;;  %vm450_vm13 = vcmp.eq.s32.totalorder %v4526_v18, %v4849_v55  ;;  %vm704_vm10 = vcmp.eq.s32.totalorder %v4722_v43, %v4584_v28 }
  0xa2   : > { %vm3701_vm6 = vmpackc.low %vm434_vm11, %vm417_vm4  ;;  %vm467_vm4 = vcmp.eq.s32.totalorder %v4529_v19, %v4849_v55 }
  0xa3   : > { %3696 = vmatpush1.bf16.msk.msra.mxu0 %vm4964_vm7, %v4260_v13  ;;  %vm652_vm7 = vcmp.eq.s32.totalorder %v4675_v38, %v4590_v29  ;;  %vm5016_vm9 = vmpackc.low %vm433_vm3, %vm416_vm12  ;;  %vm687_vm3 = vcmp.eq.s32.totalorder %v4719_v42, %v4584_v28 }
  0xa4   : > { %3698 = vmatprep.subr.msk.bf16.mxu0 %vm3697_vm8, %v4260_v13  ;;  %3672 = vmatpush1.bf16.msk.msra.mxu1 %vm3671_vm14, %v4260_v13  ;;  %vm451_vm8 = vcmp.eq.s32.totalorder %v4526_v18, %v4840_v54  ;;  %vm3673_vm11 = vmpackc.low %vm670_vm1, %vm653_vm2  ;;  %vm686_vm14 = vcmp.eq.s32.totalorder %v4719_v42, %v4590_v29  ;;  %vm703_vm2 = vcmp.eq.s32.totalorder %v4722_v43, %v4590_v29 }
  0xa5   : > { %3674 = vmatprep.subr.msk.bf16.mxu1 %vm3673_vm11, %v4260_v13  ;;  %vm3675_vm12 = vmpackc.low %vm669_vm0, %vm652_vm7  ;;  %vm502_vm7 = vcmp.eq.s32.totalorder %v4545_v21, %v4840_v54  ;;  %vm484_vm0 = vcmp.eq.s32.totalorder %v4542_v20, %v4849_v55  ;;  %vm738_vm11 = vcmp.eq.s32.totalorder %v4766_v47, %v4584_v28 }
  0xa6   : > { %vm5044_vm1 = vmpackc.low %vm467_vm4, %vm450_vm13  ;;  %vm721_vm13 = vcmp.eq.s32.totalorder %v4763_v46, %v4584_v28 }
  0xa7   : > { %3700 = vmatpush1.bf16.msk.msra.mxu0 %vm4990_vm5, %v4260_v13  ;;  %vm3705_vm5 = vmpackc.low %vm468_vm15, %vm451_vm8  ;;  %vm501_vm8 = vcmp.eq.s32.totalorder %v4545_v21, %v4849_v55 }
  0xa8   : > { %3702 = vmatprep.subr.msk.bf16.mxu0 %vm3701_vm6, %v4260_v13  ;;  %3676 = vmatpush1.bf16.msk.msra.mxu1 %vm3675_vm12, %v4260_v13  ;;  %vm485_vm6 = vcmp.eq.s32.totalorder %v4542_v20, %v4840_v54  ;;  %vm3677_vm15 = vmpackc.low %vm704_vm10, %vm687_vm3  ;;  %vm720_vm3 = vcmp.eq.s32.totalorder %v4763_v46, %v4590_v29  ;;  %vm737_vm10 = vcmp.eq.s32.totalorder %v4766_v47, %v4590_v29 }
  0xa9   : > { %3678 = vmatprep.subr.msk.bf16.mxu1 %vm3677_vm15, %v4260_v13  ;;  %vm3679_vm4 = vmpackc.low %vm703_vm2, %vm686_vm14  ;;  %vm519_vm14 = vcmp.eq.s32.totalorder %v4554_v22, %v4840_v54  ;;  %vm536_vm2 = vcmp.eq.s32.totalorder %v4561_v23, %v4840_v54  ;;  %vm283_vm15 = vcmp.eq.s32.totalorder %v4434_v1, %v5070_v36 }
  0xaa   : > { %vm3709_vm12 = vmpackc.low %vm502_vm7, %vm485_vm6  ;;  %vm518_vm6 = vcmp.eq.s32.totalorder %v4554_v22, %v4849_v55  ;;  %vm535_vm7 = vcmp.eq.s32.totalorder %v4561_v23, %v4849_v55 }
  0xab   : > { %3704 = vmatpush1.bf16.msk.msra.mxu0 %vm5016_vm9, %v4260_v13  ;;  %vm755_vm9 = vcmp.eq.s32.totalorder %v4812_v52, %v4584_v28  ;;  %v6558_v28 = vmov 0 }
  0xac   : > { %3706 = vmatprep.subr.msk.bf16.mxu0 %vm3705_vm5, %v4260_v13  ;;  %3680 = vmatpush1.bf16.msk.msra.mxu1 %vm3679_vm4, %v4260_v13  ;;  %vm5085_vm5 = vmpackc.low %vm501_vm8, %vm484_vm0  ;;  %v3052_v5 = vsel %vm755_vm9, 1.0, %v4261_v56  ;;  %vm754_vm8 = vcmp.eq.s32.totalorder %v4812_v52, %v4590_v29  ;;  %vm300_vm4 = vcmp.eq.s32.totalorder %v4439_v4, %v5070_v36 }
  0xad   : > { %v6557_v40 = vsel %vm5085_vm5, 4294967295, %v6556_v40  ;;  %vm3681_vm0 = vmpackc.low %vm738_vm11, %vm721_vm13  ;;  %vm282_vm13 = vcmp.eq.s32.totalorder %v4434_v1, %v5080_v37  ;;  %vm299_vm11 = vcmp.eq.s32.totalorder %v4439_v4, %v5080_v37  ;;  %v3051_v29 = vsel %vm754_vm8, 1.0, %v4261_v56 }
  0xae   : > { %3682 = vmatprep.subr.msk.bf16.mxu1 %vm3681_vm0, %v4260_v13  ;;  %vm3713_vm5 = vmpackc.low %vm536_vm2, %vm519_vm14  ;;  %vm6561_vm14 = vnez %v6557_v40  ;;  %vm552_vm2 = vcmp.eq.s32.totalorder %v4572_v26, %v4849_v55  ;;  %vm334_vm8 = vcmp.eq.s32.totalorder %v4448_v7, %v5070_v36  ;;  %v6607_v40 = vmov 0 }
  0xaf   : > { %3708 = vmatpush1.bf16.msk.msra.mxu0 %vm5044_vm1, %v4260_v13  ;;  %vm3683_vm1 = vmpackc.low %vm737_vm10, %vm720_vm3  ;;  %vm570_vm3 = vcmp.eq.s32.totalorder %v4575_v27, %v4840_v54  ;;  %vm6560_vm10 = vcmask 1043456  }
  0xb0   : > { %3710 = vmatprep.subr.msk.bf16.mxu0 %vm3709_vm12, %v4260_v13  ;;  %3684 = vmatpush1.bf16.msk.msra.mxu1 %vm3683_vm1, %v4260_v13  ;;  %vm5117_vm9 = vmpackc.low %vm535_vm7, %vm518_vm6  ;;  %vm553_vm12 = vcmp.eq.s32.totalorder %v4572_v26, %v4840_v54  ;;  %vm569_vm6 = vcmp.eq.s32.totalorder %v4575_v27, %v4849_v55  ;;  %vm317_vm1 = vcmp.eq.s32.totalorder %v4445_v6, %v5070_v36 }
  0xb1   : > { %v6559_v28 = vsel %vm5117_vm9, 4294967295, %v6558_v28  ;;  %3181 = vmatprep.subr.msk.mxu1 %vm6560_vm10, %v3052_v5  ;;  %vm3741_vm7 = vmpackc.low %vm300_vm4, %vm283_vm15  ;;  %vm6562_vm9 = vcmask 1043456   ;;  %vm333_vm4 = vcmp.eq.s32.totalorder %v4448_v7, %v5080_v37 }
  0xb2   : > { %vm3743_vm0 = vmpackc.low %vm299_vm11, %vm282_vm13  ;;  %vm604_vm13 = vcmp.eq.s32.totalorder %v4605_v31, %v4840_v54  ;;  %vm6565_vm11 = vnez %v6559_v28  ;;  %v6672_v28 = vmov 0 }
  0xb3   : > { %3712 = vmatpush1.bf16.msk.msra.mxu0 %vm6561_vm14, %v4260_v13  ;;  %vm3717_vm10 = vmpackc.low %vm570_vm3, %vm553_vm12  ;;  %vm316_vm14 = vcmp.eq.s32.totalorder %v4445_v6, %v5080_v37  ;;  %vm603_vm12 = vcmp.eq.s32.totalorder %v4605_v31, %v4849_v55 }
  0xb4   : > { %3714 = vmatprep.subr.msk.bf16.mxu0 %vm3713_vm5, %v4260_v13  ;;  %3182 = vmatpush1.msk.msra.mxu1 %vm6562_vm9, %v3051_v29  ;;  %vm5144_vm15 = vmpackc.low %vm569_vm6, %vm552_vm2  ;;  %vm587_vm5 = vcmp.eq.s32.totalorder %v4602_v30, %v4840_v54  ;;  %vm586_vm9 = vcmp.eq.s32.totalorder %v4602_v30, %v4849_v55  ;;  %vm351_vm6 = vcmp.eq.s32.totalorder %v4463_v11, %v5070_v36  ;;  %v6675_v29 = vmov 0 }
  0xb5   : > { %v6564_v41 = vsel %vm5144_vm15, 4294967295, %v6563_v41  ;;  %3742 = vmatprep.subr.msk.bf16.mxu1 %vm3741_vm7, %v4260_v13  ;;  %1949 = vmatmul.mubr.f32.vlgmr.msra.gmra.mrb[0].mxu1 %v4909_v61  ;;  %vm3745_vm3 = vmpackc.low %vm334_vm8, %vm317_vm1  ;;  %vm368_vm7 = vcmp.eq.s32.totalorder %v4466_v12, %v5070_v36  ;;  %vm350_vm15 = vcmp.eq.s32.totalorder %v4463_v11, %v5080_v37  ;;  %vm6566_vm1 = vcmask 818176  }
  0xb6   : > { %3744 = vmatpush1.bf16.msk.msra.mxu1 %vm3743_vm0, %v4260_v13  ;;  %vm3747_vm2 = vmpackc.low %vm333_vm4, %vm316_vm14  ;;  %vm367_vm0 = vcmp.eq.s32.totalorder %v4466_v12, %v5080_v37  ;;  %3301 = vmatprep.mubr.msk.f32.mxu1 %vm6566_vm1, %v4450_v8  ;;  %vm638_vm14 = vcmp.eq.s32.totalorder %v4637_v35, %v4840_v54  ;;  %vm6569_vm4 = vnez %v6564_v41  ;;  %vm402_vm1 = vcmp.eq.s32.totalorder %v4497_v15, %v5070_v36 }
  0xb7   : > { %3716 = vmatpush1.bf16.msk.msra.mxu0 %vm6565_vm11, %v4260_v13  ;;  %3746 = vmatprep.subr.msk.bf16.mxu1 %vm3745_vm3, %v4260_v13  ;;  %vm3721_vm11 = vmpackc.low %vm604_vm13, %vm587_vm5  ;;  %vm620_vm5 = vcmp.eq.s32.totalorder %v4634_v34, %v4849_v55  ;;  %vm637_vm13 = vcmp.eq.s32.totalorder %v4637_v35, %v4849_v55  ;;  %vm385_vm3 = vcmp.eq.s32.totalorder %v4494_v14, %v5070_v36  ;;  %v6677_v41 = vmov 0 }
  0xb8   : > { %3718 = vmatprep.subr.msk.bf16.mxu0 %vm3717_vm10, %v4260_v13  ;;  %vm5177_vm8 = vmpackc.low %vm603_vm12, %vm586_vm9  ;;  %vm621_vm10 = vcmp.eq.s32.totalorder %v4634_v34, %v4840_v54 }
  0xb9   : > { %v6568_v44 = vsel %vm5177_vm8, 4294967295, %v6567_v44  ;;  %vm3749_vm9 = vmpackc.low %vm368_vm7, %vm351_vm6  ;;  %vm384_vm8 = vcmp.eq.s32.totalorder %v4494_v14, %v5080_v37  ;;  %vm672_vm7 = vcmp.eq.s32.totalorder %v4678_v39, %v4840_v54 }
  0xba   : > { %3748 = vmatpush1.bf16.msk.msra.mxu1 %vm3747_vm2, %v4260_v13  ;;  %vm3751_vm12 = vmpackc.low %vm367_vm0, %vm350_vm15  ;;  %vm401_vm2 = vcmp.eq.s32.totalorder %v4497_v15, %v5080_v37  ;;  %vm655_vm15 = vcmp.eq.s32.totalorder %v4675_v38, %v4840_v54  ;;  %vm654_vm0 = vcmp.eq.s32.totalorder %v4675_v38, %v4849_v55 }
  0xbb   : > { %3720 = vmatpush1.bf16.msk.msra.mxu0 %vm6569_vm4, %v4260_v13  ;;  %3750 = vmatprep.subr.msk.bf16.mxu1 %vm3749_vm9, %v4260_v13  ;;  %vm3725_vm4 = vmpackc.low %vm638_vm14, %vm621_vm10  ;;  %vm671_vm10 = vcmp.eq.s32.totalorder %v4678_v39, %v4849_v55  ;;  %vm436_vm9 = vcmp.eq.s32.totalorder %v4513_v17, %v5070_v36 }
  0xbc   : > { %3722 = vmatprep.subr.msk.bf16.mxu0 %vm3721_vm11, %v4260_v13  ;;  %vm5203_vm6 = vmpackc.low %vm637_vm13, %vm620_vm5  ;;  %vm6572_vm11 = vnez %v6568_v44  ;;  %vm419_vm13 = vcmp.eq.s32.totalorder %v4510_v16, %v5070_v36  ;;  %v6680_v44 = vmov 0 }
  0xbd   : > { %v6571_v45 = vsel %vm5203_vm6, 4294967295, %v6570_v45  ;;  %vm3753_vm14 = vmpackc.low %vm402_vm1, %vm385_vm3  ;;  %vm418_vm6 = vcmp.eq.s32.totalorder %v4510_v16, %v5080_v37  ;;  %vm706_vm1 = vcmp.eq.s32.totalorder %v4722_v43, %v4840_v54 }
  0xbe   : > { %3752 = vmatpush1.bf16.msk.msra.mxu1 %vm3751_vm12, %v4260_v13  ;;  %vm3755_vm5 = vmpackc.low %vm401_vm2, %vm384_vm8  ;;  %vm435_vm12 = vcmp.eq.s32.totalorder %v4513_v17, %v5080_v37  ;;  %vm689_vm8 = vcmp.eq.s32.totalorder %v4719_v42, %v4840_v54  ;;  %vm688_vm2 = vcmp.eq.s32.totalorder %v4719_v42, %v4849_v55 }
  0xbf   : > { %3724 = vmatpush1.bf16.msk.msra.mxu0 %vm6572_vm11, %v4260_v13  ;;  %3754 = vmatprep.subr.msk.bf16.mxu1 %vm3753_vm14, %v4260_v13  ;;  %vm3729_vm11 = vmpackc.low %vm672_vm7, %vm655_vm15  ;;  %vm705_vm15 = vcmp.eq.s32.totalorder %v4722_v43, %v4849_v55  ;;  %vm470_vm14 = vcmp.eq.s32.totalorder %v4529_v19, %v5070_v36 }
  0xc0   : > { %3726 = vmatprep.subr.msk.bf16.mxu0 %vm3725_vm4, %v4260_v13  ;;  %vm5229_vm3 = vmpackc.low %vm671_vm10, %vm654_vm0  ;;  %vm6575_vm4 = vnez %v6571_v45  ;;  %vm453_vm10 = vcmp.eq.s32.totalorder %v4526_v18, %v5070_v36  ;;  %v5647_v45 = vld [vmem:[#allocation2 + $0x8] sm:$0xff] }
  0xc1   : > { %v6574_v48 = vsel %vm5229_vm3, 4294967295, %v6573_v48  ;;  %vm3757_vm7 = vmpackc.low %vm436_vm9, %vm419_vm13  ;;  %vm452_vm3 = vcmp.eq.s32.totalorder %v4526_v18, %v5080_v37  ;;  %vm740_vm9 = vcmp.eq.s32.totalorder %v4766_v47, %v4840_v54 }
  0xc2   : > { %3756 = vmatpush1.bf16.msk.msra.mxu1 %vm3755_vm5, %v4260_v13  ;;  %vm3759_vm0 = vmpackc.low %vm435_vm12, %vm418_vm6  ;;  %vm469_vm5 = vcmp.eq.s32.totalorder %v4529_v19, %v5080_v37  ;;  %vm723_vm6 = vcmp.eq.s32.totalorder %v4763_v46, %v4840_v54  ;;  %vm722_vm12 = vcmp.eq.s32.totalorder %v4763_v46, %v4849_v55 }
  0xc3   : > { %3728 = vmatpush1.bf16.msk.msra.mxu0 %vm6575_vm4, %v4260_v13  ;;  %3758 = vmatprep.subr.msk.bf16.mxu1 %vm3757_vm7, %v4260_v13  ;;  %vm3733_vm4 = vmpackc.low %vm706_vm1, %vm689_vm8  ;;  %vm739_vm8 = vcmp.eq.s32.totalorder %v4766_v47, %v4849_v55  ;;  %vm504_vm7 = vcmp.eq.s32.totalorder %v4545_v21, %v5070_v36 }
  0xc4   : > { %3730 = vmatprep.subr.msk.bf16.mxu0 %vm3729_vm11, %v4260_v13  ;;  %vm5258_vm13 = vmpackc.low %vm705_vm15, %vm688_vm2  ;;  %vm6578_vm11 = vnez %v6574_v48  ;;  %vm487_vm15 = vcmp.eq.s32.totalorder %v4542_v20, %v5070_v36  ;;  %v6683_v48 = vmov 0 }
  0xc5   : > { %v6577_v53 = vsel %vm5258_vm13, 4294967295, %v6576_v53  ;;  %vm3761_vm1 = vmpackc.low %vm470_vm14, %vm453_vm10  ;;  %vm486_vm13 = vcmp.eq.s32.totalorder %v4542_v20, %v5080_v37 }
  0xc6   : > { %3760 = vmatpush1.bf16.msk.msra.mxu1 %vm3759_vm0, %v4260_v13  ;;  %vm3763_vm2 = vmpackc.low %vm469_vm5, %vm452_vm3  ;;  %vm503_vm0 = vcmp.eq.s32.totalorder %v4545_v21, %v5080_v37  ;;  %vm757_vm3 = vcmp.eq.s32.totalorder %v4812_v52, %v4840_v54  ;;  %vm6581_vm14 = vnez %v6577_v53  ;;  %vm302_vm5 = vcmp.eq.s32.totalorder %v4439_v4, %v5276_v57 }
  0xc7   : > { %3732 = vmatpush1.bf16.msk.msra.mxu0 %vm6578_vm11, %v4260_v13  ;;  %3762 = vmatprep.subr.msk.bf16.mxu1 %vm3761_vm1, %v4260_v13  ;;  %vm3737_vm11 = vmpackc.low %vm740_vm9, %vm723_vm6  ;;  %v3054_v3 = vsel %vm757_vm3, 1.0, %v4261_v56  ;;  %vm756_vm1 = vcmp.eq.s32.totalorder %v4812_v52, %v4849_v55  ;;  %v6582_v54 = vmov 0  ;;  %vm336_vm3 = vcmp.eq.s32.totalorder %v4448_v7, %v5276_v57 }
  0xc8   : > { %3734 = vmatprep.subr.msk.bf16.mxu0 %vm3733_vm4, %v4260_v13  ;;  %vm5289_vm10 = vmpackc.low %vm739_vm8, %vm722_vm12  ;;  %vm285_vm4 = vcmp.eq.s32.totalorder %v4434_v1, %v5276_v57  ;;  %vm521_vm12 = vcmp.eq.s32.totalorder %v4554_v22, %v5070_v36  ;;  %vm538_vm8 = vcmp.eq.s32.totalorder %v4561_v23, %v5070_v36  ;;  %v3053_v55 = vsel %vm756_vm1, 1.0, %v4261_v56 }
  0xc9   : > { %vm3765_vm6 = vmpackc.low %vm504_vm7, %vm487_vm15  ;;  %vm537_vm15 = vcmp.eq.s32.totalorder %v4561_v23, %v5080_v37  ;;  %vm318_vm1 = vcmp.eq.s32.totalorder %v4445_v6, %v5298_v58  ;;  %v6623_v53 = vmov 0 }
  0xca   : > { %3764 = vmatpush1.bf16.msk.msra.mxu1 %vm3763_vm2, %v4260_v13  ;;  %vm3767_vm9 = vmpackc.low %vm503_vm0, %vm486_vm13  ;;  %vm520_vm2 = vcmp.eq.s32.totalorder %v4554_v22, %v5080_v37  ;;  %vm284_vm13 = vcmp.eq.s32.totalorder %v4434_v1, %v5298_v58  ;;  %vm319_vm0 = vcmp.eq.s32.totalorder %v4445_v6, %v5276_v57 }
  0xcb   : > { %3736 = vmatpush1.bf16.msk.msra.mxu0 %vm6581_vm14, %v4260_v13  ;;  %3766 = vmatprep.subr.msk.bf16.mxu1 %vm3765_vm6, %v4260_v13  ;;  %vm5321_vm7 = vmpackc.low %vm302_vm5, %vm285_vm4  ;;  %vm6584_vm4 = vcmask 1043456   ;;  %vm555_vm6 = vcmp.eq.s32.totalorder %v4572_v26, %v5070_v36 }
  0xcc   : > { %3738 = vmatprep.subr.msk.bf16.mxu0 %vm3737_vm11, %v4260_v13  ;;  %v6583_v54 = vsel %vm5321_vm7, 4294967295, %v6582_v54  ;;  %vm301_vm11 = vcmp.eq.s32.totalorder %v4439_v4, %v5298_v58  ;;  %vm3769_vm14 = vmpackc.low %vm538_vm8, %vm521_vm12  ;;  %vm571_vm12 = vcmp.eq.s32.totalorder %v4575_v27, %v5080_v37 }
  0xcd   : > { %vm3771_vm5 = vmpackc.low %vm537_vm15, %vm520_vm2  ;;  %vm335_vm2 = vcmp.eq.s32.totalorder %v4448_v7, %v5298_v58 }
  0xce   : > { %3768 = vmatpush1.bf16.msk.msra.mxu1 %vm3767_vm9, %v4260_v13  ;;  %vm5344_vm7 = vmpackc.low %vm301_vm11, %vm284_vm13  ;;  %vm554_vm9 = vcmp.eq.s32.totalorder %v4572_v26, %v5080_v37  ;;  %vm370_vm11 = vcmp.eq.s32.totalorder %v4466_v12, %v5276_v57 }
  0xcf   : > { %3740 = vmatpush1.bf16.msk.msra.mxu0 %vm5289_vm10, %v4260_v13  ;;  %3770 = vmatprep.subr.msk.bf16.mxu1 %vm3769_vm14, %v4260_v13  ;;  %vm572_vm10 = vcmp.eq.s32.totalorder %v4575_v27, %v5070_v36  ;;  %vm5352_vm8 = vmpackc.low %vm336_vm3, %vm319_vm0  ;;  %vm6590_vm3 = vnez %v6583_v54  ;;  %v6630_v54 = vmov 0 }
  0xd0   : > { %3240 = vmatprep.subr.msk.mxu0 %vm6584_vm4, %v3054_v3  ;;  %vm6589_vm15 = vmmov %vm6584_vm4  ;;  %vm589_vm4 = vcmp.eq.s32.totalorder %v4602_v30, %v5070_v36  ;;  %v6627_v3 = vmov 0 }
  0xd1   : > { %vm3773_vm0 = vmpackc.low %vm572_vm10, %vm555_vm6  ;;  %vm605_vm6 = vcmp.eq.s32.totalorder %v4605_v31, %v5080_v37  ;;  %vm6593_vm10 = vcmp.eq.s32.totalorder %v4463_v11, %v5276_v57 }
  0xd2   : > { %3772 = vmatpush1.bf16.msk.msra.mxu1 %vm3771_vm5, %v4260_v13  ;;  %vm3775_vm14 = vmpackc.low %vm571_vm12, %vm554_vm9  ;;  %vm588_vm5 = vcmp.eq.s32.totalorder %v4602_v30, %v5080_v37  ;;  %vm352_vm9 = vcmp.eq.s32.totalorder %v4463_v11, %v5298_v58  ;;  %vm369_vm12 = vcmp.eq.s32.totalorder %v4466_v12, %v5298_v58 }
  0xd3   : > { %3241 = vmatpush1.msk.msra.mxu0 %vm6589_vm15, %v3053_v55  ;;  %vm606_vm15 = vcmp.eq.s32.totalorder %v4605_v31, %v5070_v36  ;;  %vm5377_vm13 = vmpackc.low %vm335_vm2, %vm318_vm1  ;;  %3774 = vmatprep.subr.msk.bf16.mxu1 %vm3773_vm0, %v4260_v13  ;;  %vm6596_vm1 = vcmask 818176   ;;  %vm387_vm2 = vcmp.eq.s32.totalorder %v4494_v14, %v5276_v57  ;;  %v6633_v55 = vmov 0 }
  0xd4   : > { %2020 = vmatmul.mubr.f32.vlgmr.msra.gmra.mrb[2].mxu0 %v4909_v61  ;;  %3798 = vmatprep.subr.msk.bf16.mxu0 %vm6590_vm3, %v4260_v13  ;;  %vm3779_vm0 = vmpackc.low %vm605_vm6, %vm588_vm5  ;;  %vm623_vm3 = vcmp.eq.s32.totalorder %v4634_v34, %v5070_v36  ;;  %vm386_vm5 = vcmp.eq.s32.totalorder %v4494_v14, %v5298_v58  ;;  %vm403_vm6 = vcmp.eq.s32.totalorder %v4497_v15, %v5298_v58 }
  0xd5   : > { %3800 = vmatpush1.bf16.msk.msra.mxu0 %vm5344_vm7, %v4260_v13  ;;  %vm5392_vm7 = vmpackc.low %vm370_vm11, %vm6593_vm10  ;;  %3360 = vmatprep.mubr.msk.f32.mxu0 %vm6596_vm1, %v4450_v8  ;;  %vm640_vm10 = vcmp.eq.s32.totalorder %v4637_v35, %v5070_v36  ;;  %v5969_v8 = vrot.slane %v5247_v49, %v238_v10 }
  0xd6   : > { %3802 = vmatprep.subr.msk.bf16.mxu0 %vm5352_vm8, %v4260_v13  ;;  %vm404_vm8 = vcmp.eq.s32.totalorder %v4497_v15, %v5276_v57  ;;  %3776 = vmatpush1.bf16.msk.msra.mxu1 %vm3775_vm14, %v4260_v13  ;;  %vm3777_vm11 = vmpackc.low %vm606_vm15, %vm589_vm4  ;;  %vm622_vm14 = vcmp.eq.s32.totalorder %v4634_v34, %v5080_v37  ;;  %vm639_vm4 = vcmp.eq.s32.totalorder %v4637_v35, %v5080_v37 }
  0xd7   : > { %3778 = vmatprep.subr.msk.bf16.mxu1 %vm3777_vm11, %v4260_v13  ;;  %vm3807_vm1 = vmpackc.low %vm369_vm12, %vm352_vm9  ;;  %vm438_vm9 = vcmp.eq.s32.totalorder %v4513_v17, %v5276_v57 }
  0xd8   : > { %vm3809_vm15 = vmpackc.low %vm404_vm8, %vm387_vm2  ;;  %vm674_vm2 = vcmp.eq.s32.totalorder %v4678_v39, %v5070_v36 }
  0xd9   : > { %3804 = vmatpush1.bf16.msk.msra.mxu0 %vm5377_vm13, %v4260_v13  ;;  %vm421_vm13 = vcmp.eq.s32.totalorder %v4510_v16, %v5276_v57  ;;  %vm3781_vm12 = vmpackc.low %vm640_vm10, %vm623_vm3  ;;  %vm673_vm3 = vcmp.eq.s32.totalorder %v4678_v39, %v5080_v37 }
  0xda   : > { %3806 = vmatprep.subr.msk.bf16.mxu0 %vm5392_vm7, %v4260_v13  ;;  %3780 = vmatpush1.bf16.msk.msra.mxu1 %vm3779_vm0, %v4260_v13  ;;  %vm3783_vm11 = vmpackc.low %vm639_vm4, %vm622_vm14  ;;  %vm657_vm7 = vcmp.eq.s32.totalorder %v4675_v38, %v5070_v36  ;;  %vm656_vm0 = vcmp.eq.s32.totalorder %v4675_v38, %v5080_v37  ;;  %vm420_vm14 = vcmp.eq.s32.totalorder %v4510_v16, %v5298_v58 }
  0xdb   : > { %3782 = vmatprep.subr.msk.bf16.mxu1 %vm3781_vm12, %v4260_v13  ;;  %vm3811_vm8 = vmpackc.low %vm403_vm6, %vm386_vm5  ;;  %vm437_vm4 = vcmp.eq.s32.totalorder %v4513_v17, %v5298_v58  ;;  %vm455_vm12 = vcmp.eq.s32.totalorder %v4526_v18, %v5276_v57 }
  0xdc   : > { %vm3813_vm10 = vmpackc.low %vm438_vm9, %vm421_vm13  ;;  %vm708_vm13 = vcmp.eq.s32.totalorder %v4722_v43, %v5070_v36 }
  0xdd   : > { %3808 = vmatpush1.bf16.msk.msra.mxu0 %vm3807_vm1, %v4260_v13  ;;  %vm472_vm1 = vcmp.eq.s32.totalorder %v4529_v19, %v5276_v57  ;;  %vm3785_vm5 = vmpackc.low %vm674_vm2, %vm657_vm7  ;;  %vm707_vm2 = vcmp.eq.s32.totalorder %v4722_v43, %v5080_v37 }
  0xde   : > { %3810 = vmatprep.subr.msk.bf16.mxu0 %vm3809_vm15, %v4260_v13  ;;  %3784 = vmatpush1.bf16.msk.msra.mxu1 %vm3783_vm11, %v4260_v13  ;;  %vm3787_vm6 = vmpackc.low %vm673_vm3, %vm656_vm0  ;;  %vm691_vm15 = vcmp.eq.s32.totalorder %v4719_v42, %v5070_v36  ;;  %vm690_vm11 = vcmp.eq.s32.totalorder %v4719_v42, %v5080_v37  ;;  %vm454_vm0 = vcmp.eq.s32.totalorder %v4526_v18, %v5298_v58 }
  0xdf   : > { %3786 = vmatprep.subr.msk.bf16.mxu1 %vm3785_vm5, %v4260_v13  ;;  %vm3815_vm9 = vmpackc.low %vm437_vm4, %vm420_vm14  ;;  %vm471_vm3 = vcmp.eq.s32.totalorder %v4529_v19, %v5298_v58  ;;  %vm489_vm5 = vcmp.eq.s32.totalorder %v4542_v20, %v5276_v57 }
  0xe0   : > { %vm3817_vm7 = vmpackc.low %vm472_vm1, %vm455_vm12  ;;  %vm742_vm12 = vcmp.eq.s32.totalorder %v4766_v47, %v5070_v36 }
  0xe1   : > { %3812 = vmatpush1.bf16.msk.msra.mxu0 %vm3811_vm8, %v4260_v13  ;;  %vm506_vm8 = vcmp.eq.s32.totalorder %v4545_v21, %v5276_v57  ;;  %vm3789_vm14 = vmpackc.low %vm708_vm13, %vm691_vm15  ;;  %vm741_vm15 = vcmp.eq.s32.totalorder %v4766_v47, %v5080_v37 }
  0xe2   : > { %3814 = vmatprep.subr.msk.bf16.mxu0 %vm3813_vm10, %v4260_v13  ;;  %3788 = vmatpush1.bf16.msk.msra.mxu1 %vm3787_vm6, %v4260_v13  ;;  %vm3791_vm4 = vmpackc.low %vm707_vm2, %vm690_vm11  ;;  %vm725_vm10 = vcmp.eq.s32.totalorder %v4763_v46, %v5070_v36  ;;  %vm724_vm6 = vcmp.eq.s32.totalorder %v4763_v46, %v5080_v37  ;;  %vm488_vm11 = vcmp.eq.s32.totalorder %v4542_v20, %v5298_v58 }
  0xe3   : > { %3790 = vmatprep.subr.msk.bf16.mxu1 %vm3789_vm14, %v4260_v13  ;;  %vm5480_vm1 = vmpackc.low %vm471_vm3, %vm454_vm0  ;;  %vm759_vm2 = vcmp.eq.s32.totalorder %v4812_v52, %v5070_v36  ;;  %vm540_vm0 = vcmp.eq.s32.totalorder %v4561_v23, %v5276_v57 }
  0xe4   : > { %vm5489_vm13 = vmpackc.low %vm506_vm8, %vm489_vm5  ;;  %vm522_vm5 = vcmp.eq.s32.totalorder %v4554_v22, %v5298_v58  ;;  %vm539_vm8 = vcmp.eq.s32.totalorder %v4561_v23, %v5298_v58  ;;  %v3056_v25 = vsel %vm759_vm2, 1.0, %v4261_v56 }
  0xe5   : > { %3816 = vmatpush1.bf16.msk.msra.mxu0 %vm3815_vm9, %v4260_v13  ;;  %vm505_vm9 = vcmp.eq.s32.totalorder %v4545_v21, %v5298_v58  ;;  %vm3793_vm3 = vmpackc.low %vm742_vm12, %vm725_vm10  ;;  %vm557_vm10 = vcmp.eq.s32.totalorder %v4572_v26, %v5276_v57  ;;  %vm574_vm12 = vcmp.eq.s32.totalorder %v4575_v27, %v5276_v57 }
  0xe6   : > { %3818 = vmatprep.subr.msk.bf16.mxu0 %vm3817_vm7, %v4260_v13  ;;  %vm523_vm7 = vcmp.eq.s32.totalorder %v4554_v22, %v5276_v57  ;;  %3792 = vmatpush1.bf16.msk.msra.mxu1 %vm3791_vm4, %v4260_v13  ;;  %vm3795_vm14 = vmpackc.low %vm741_vm15, %vm724_vm6  ;;  %vm287_vm6 = vcmp.eq.s32.totalorder %v4434_v1, %v5502_v9  ;;  %vm304_vm15 = vcmp.eq.s32.totalorder %v4439_v4, %v5502_v9 }
  0xe7   : > { %3794 = vmatprep.subr.msk.bf16.mxu1 %vm3793_vm3, %v4260_v13  ;;  %vm5531_vm4 = vmpackc.low %vm505_vm9, %vm488_vm11  ;;  %vm758_vm3 = vcmp.eq.s32.totalorder %v4812_v52, %v5080_v37  ;;  %vm303_vm9 = vcmp.eq.s32.totalorder %v4439_v4, %v5515_v33  ;;  %v6065_v37 = vld [vmem:[#allocation2] sm:$0xff] }
  0xe8   : > { %vm5559_vm11 = vmpackc.low %vm539_vm8, %vm522_vm5  ;;  %v3055_v5 = vsel %vm758_vm3, 1.0, %v4261_v56  ;;  %vm338_vm5 = vcmp.eq.s32.totalorder %v4448_v7, %v5502_v9  ;;  %vm556_vm8 = vcmp.eq.s32.totalorder %v4572_v26, %v5298_v58  ;;  %vm608_vm3 = vcmp.eq.s32.totalorder %v4605_v31, %v5276_v57 }
  0xe9   : > { %3820 = vmatpush1.bf16.msk.msra.mxu0 %vm5480_vm1, %v4260_v13  ;;  %vm5551_vm1 = vmpackc.low %vm540_vm0, %vm523_vm7  ;;  %vm6609_vm7 = vcmask 1043456   ;;  %vm321_vm0 = vcmp.eq.s32.totalorder %v4445_v6, %v5502_v9 }
  0xea   : > { %3822 = vmatprep.subr.msk.bf16.mxu0 %vm5489_vm13, %v4260_v13  ;;  %3796 = vmatpush1.bf16.msk.msra.mxu1 %vm3795_vm14, %v4260_v13  ;;  %vm286_vm13 = vcmp.eq.s32.totalorder %v4434_v1, %v5515_v33  ;;  %vm5568_vm2 = vmpackc.low %vm574_vm12, %vm557_vm10  ;;  %vm573_vm14 = vcmp.eq.s32.totalorder %v4575_v27, %v5298_v58  ;;  %vm591_vm12 = vcmp.eq.s32.totalorder %v4602_v30, %v5276_v57 }
  0xeb   : > { %v6608_v40 = vsel %vm5568_vm2, 4294967295, %v6607_v40  ;;  %3299 = vmatprep.subr.msk.mxu1 %vm6609_vm7, %v3056_v25  ;;  %vm3853_vm10 = vmpackc.low %vm304_vm15, %vm287_vm6  ;;  %vm6610_vm2 = vcmask 1043456   ;;  %vm320_vm6 = vcmp.eq.s32.totalorder %v4445_v6, %v5515_v33  ;;  %vm337_vm15 = vcmp.eq.s32.totalorder %v4448_v7, %v5515_v33 }
  0xec   : > { %vm3855_vm7 = vmpackc.low %vm303_vm9, %vm286_vm13  ;;  %vm355_vm13 = vcmp.eq.s32.totalorder %v4463_v11, %v5502_v9  ;;  %vm372_vm9 = vcmp.eq.s32.totalorder %v4466_v12, %v5502_v9 }
  0xed   : > { %3824 = vmatpush1.bf16.msk.msra.mxu0 %vm5531_vm4, %v4260_v13  ;;  %vm5593_vm4 = vmpackc.low %vm338_vm5, %vm321_vm0  ;;  %vm590_vm0 = vcmp.eq.s32.totalorder %v4602_v30, %v5298_v58  ;;  %vm607_vm5 = vcmp.eq.s32.totalorder %v4605_v31, %v5298_v58 }
  0xee   : > { %3826 = vmatprep.subr.msk.bf16.mxu0 %vm5551_vm1, %v4260_v13  ;;  %3300 = vmatpush1.msk.msra.mxu1 %vm6610_vm2, %v3055_v5  ;;  %vm5601_vm1 = vmpackc.low %vm573_vm14, %vm556_vm8  ;;  %vm6617_vm8 = vnez %v6608_v40  ;;  %vm625_vm14 = vcmp.eq.s32.totalorder %v4634_v34, %v5276_v57  ;;  %v6666_v40 = vmov 0 }
  0xef   : > { %3854 = vmatprep.subr.msk.bf16.mxu1 %vm3853_vm10, %v4260_v13  ;;  %2091 = vmatmul.mubr.f32.vlgmr.msra.gmra.mrb[2].mxu1 %v4909_v61  ;;  %vm5614_vm2 = vmpackc.low %vm608_vm3, %vm591_vm12  ;;  %vm354_vm3 = vcmp.eq.s32.totalorder %v4463_v11, %v5515_v33 }
  0xf0   : > { %3856 = vmatpush1.bf16.msk.msra.mxu1 %vm3855_vm7, %v4260_v13  ;;  %vm3859_vm10 = vmpackc.low %vm337_vm15, %vm320_vm6  ;;  %vm371_vm7 = vcmp.eq.s32.totalorder %v4466_v12, %v5515_v33  ;;  %vm389_vm6 = vcmp.eq.s32.totalorder %v4494_v14, %v5502_v9  ;;  %vm406_vm15 = vcmp.eq.s32.totalorder %v4497_v15, %v5502_v9 }
  0xf1   : > { %3828 = vmatpush1.bf16.msk.msra.mxu0 %vm5559_vm11, %v4260_v13  ;;  %vm642_vm11 = vcmp.eq.s32.totalorder %v4637_v35, %v5276_v57  ;;  %3858 = vmatprep.subr.msk.bf16.mxu1 %vm5593_vm4, %v4260_v13  ;;  %vm5639_vm12 = vmpackc.low %vm372_vm9, %vm355_vm13  ;;  %vm6620_vm4 = vcmask 818176   ;;  %vm624_vm9 = vcmp.eq.s32.totalorder %v4634_v34, %v5298_v58 }
  0xf2   : > { %3830 = vmatprep.subr.msk.bf16.mxu0 %vm6617_vm8, %v4260_v13  ;;  %3419 = vmatprep.mubr.msk.f32.mxu1 %vm6620_vm4, %v5647_v45  ;;  %vm5651_vm8 = vmpackc.low %vm607_vm5, %vm590_vm0  ;;  %vm641_vm0 = vcmp.eq.s32.totalorder %v4637_v35, %v5298_v58  ;;  %vm659_vm5 = vcmp.eq.s32.totalorder %v4675_v38, %v5276_v57 }
  0xf3   : > { %vm5662_vm13 = vmpackc.low %vm642_vm11, %vm625_vm14 }
  0xf4   : > { %v6624_v53 = vsel %vm5662_vm13, 4294967295, %v6623_v53  ;;  %3860 = vmatpush1.bf16.msk.msra.mxu1 %vm3859_vm10, %v4260_v13  ;;  %vm3863_vm14 = vmpackc.low %vm371_vm7, %vm354_vm3  ;;  %vm405_vm10 = vcmp.eq.s32.totalorder %v4497_v15, %v5515_v33  ;;  %vm440_vm13 = vcmp.eq.s32.totalorder %v4513_v17, %v5502_v9  ;;  %vm658_vm7 = vcmp.eq.s32.totalorder %v4675_v38, %v5298_v58 }
  0xf5   : > { %3832 = vmatpush1.bf16.msk.msra.mxu0 %vm5601_vm1, %v4260_v13  ;;  %vm676_vm1 = vcmp.eq.s32.totalorder %v4678_v39, %v5276_v57  ;;  %3862 = vmatprep.subr.msk.bf16.mxu1 %vm5639_vm12, %v4260_v13  ;;  %vm3865_vm11 = vmpackc.low %vm406_vm15, %vm389_vm6  ;;  %vm423_vm12 = vcmp.eq.s32.totalorder %v4510_v16, %v5502_v9  ;;  %vm675_vm6 = vcmp.eq.s32.totalorder %v4678_v39, %v5298_v58 }
  0xf6   : > { %3834 = vmatprep.subr.msk.bf16.mxu0 %vm5614_vm2, %v4260_v13  ;;  %vm388_vm2 = vcmp.eq.s32.totalorder %v4494_v14, %v5515_v33  ;;  %vm5691_vm4 = vmpackc.low %vm641_vm0, %vm624_vm9  ;;  %vm6629_vm15 = vnez %v6624_v53  ;;  %vm693_vm9 = vcmp.eq.s32.totalorder %v4719_v42, %v5276_v57 }
  0xf7   : > { %v6626_v2 = vsel %vm5691_vm4, 4294967295, %v6625_v2  ;;  %vm5702_vm3 = vmpackc.low %vm676_vm1, %vm659_vm5  ;;  %vm422_vm1 = vcmp.eq.s32.totalorder %v4510_v16, %v5515_v33  ;;  %vm474_vm4 = vcmp.eq.s32.totalorder %v4529_v19, %v5502_v9 }
  0xf8   : > { %v6628_v3 = vsel %vm5702_vm3, 4294967295, %v6627_v3  ;;  %3864 = vmatpush1.bf16.msk.msra.mxu1 %vm3863_vm14, %v4260_v13  ;;  %vm3867_vm0 = vmpackc.low %vm405_vm10, %vm388_vm2  ;;  %vm439_vm14 = vcmp.eq.s32.totalorder %v4513_v17, %v5515_v33  ;;  %vm692_vm2 = vcmp.eq.s32.totalorder %v4719_v42, %v5298_v58  ;;  %vm709_vm10 = vcmp.eq.s32.totalorder %v4722_v43, %v5298_v58 }
  0xf9   : > { %3836 = vmatpush1.bf16.msk.msra.mxu0 %vm5651_vm8, %v4260_v13  ;;  %vm710_vm8 = vcmp.eq.s32.totalorder %v4722_v43, %v5276_v57  ;;  %3866 = vmatprep.subr.msk.bf16.mxu1 %vm3865_vm11, %v4260_v13  ;;  %vm3869_vm5 = vmpackc.low %vm440_vm13, %vm423_vm12  ;;  %vm6632_vm11 = vnez %v6626_v2  ;;  %vm6635_vm12 = vnez %v6628_v3  ;;  %v6243_v3 = vld [vmem:[%s4428_s25 + $0x10] ss:$0 sm:$0xff] }
  0xfa   : > { %3838 = vmatprep.subr.msk.bf16.mxu0 %vm6629_vm15, %v4260_v13  ;;  %vm5723_vm3 = vmpackc.low %vm675_vm6, %vm658_vm7  ;;  %vm457_vm15 = vcmp.eq.s32.totalorder %v4526_v18, %v5502_v9  ;;  %vm727_vm7 = vcmp.eq.s32.totalorder %v4763_v46, %v5276_v57  ;;  %vm744_vm6 = vcmp.eq.s32.totalorder %v4766_v47, %v5276_v57 }
  0xfb   : > { %v6631_v54 = vsel %vm5723_vm3, 4294967295, %v6630_v54  ;;  %vm5734_vm13 = vmpackc.low %vm710_vm8, %vm693_vm9  ;;  %vm508_vm3 = vcmp.eq.s32.totalorder %v4545_v21, %v5502_v9 }
  0xfc   : > { %v6634_v55 = vsel %vm5734_vm13, 4294967295, %v6633_v55  ;;  %3868 = vmatpush1.bf16.msk.msra.mxu1 %vm3867_vm0, %v4260_v13  ;;  %vm3871_vm9 = vmpackc.low %vm439_vm14, %vm422_vm1  ;;  %vm473_vm0 = vcmp.eq.s32.totalorder %v4529_v19, %v5515_v33  ;;  %vm726_vm14 = vcmp.eq.s32.totalorder %v4763_v46, %v5298_v58 }
  0xfd   : > { %3840 = vmatpush1.bf16.msk.msra.mxu0 %vm6632_vm11, %v4260_v13  ;;  %3870 = vmatprep.subr.msk.bf16.mxu1 %vm3869_vm5, %v4260_v13  ;;  %vm3873_vm8 = vmpackc.low %vm474_vm4, %vm457_vm15  ;;  %vm456_vm11 = vcmp.eq.s32.totalorder %v4526_v18, %v5515_v33  ;;  %vm6638_vm5 = vnez %v6631_v54  ;;  %vm6641_vm1 = vnez %v6634_v55  ;;  %vm743_vm15 = vcmp.eq.s32.totalorder %v4766_v47, %v5298_v58 }
  0xfe   : > { %3842 = vmatprep.subr.msk.bf16.mxu0 %vm6635_vm12, %v4260_v13  ;;  %vm5755_vm13 = vmpackc.low %vm709_vm10, %vm692_vm2  ;;  %vm491_vm12 = vcmp.eq.s32.totalorder %v4542_v20, %v5502_v9 }
  0xff   : > { %vm5766_vm4 = vmpackc.low %vm744_vm6, %vm727_vm7  ;;  %vm490_vm7 = vcmp.eq.s32.totalorder %v4542_v20, %v5515_v33  ;;  %vm507_vm6 = vcmp.eq.s32.totalorder %v4545_v21, %v5515_v33 }
 0x100   : > { %3872 = vmatpush1.bf16.msk.msra.mxu1 %vm3871_vm9, %v4260_v13  ;;  %vm3875_vm2 = vmpackc.low %vm473_vm0, %vm456_vm11  ;;  %vm761_vm9 = vcmp.eq.s32.totalorder %v4812_v52, %v5276_v57  ;;  %vm289_vm11 = vcmp.eq.s32.totalorder %v4434_v1, %v5781_v62  ;;  %vm306_vm0 = vcmp.eq.s32.totalorder %v4439_v4, %v5781_v62 }
 0x101   : > { %3844 = vmatpush1.bf16.msk.msra.mxu0 %vm6638_vm5, %v4260_v13  ;;  %3874 = vmatprep.subr.msk.bf16.mxu1 %vm3873_vm8, %v4260_v13  ;;  %vm3877_vm10 = vmpackc.low %vm508_vm3, %vm491_vm12  ;;  %vm525_vm5 = vcmp.eq.s32.totalorder %v4554_v22, %v5502_v9  ;;  %vm542_vm3 = vcmp.eq.s32.totalorder %v4561_v23, %v5502_v9  ;;  %v3058_v50 = vsel %vm761_vm9, 1.0, %v4261_v56  ;;  %vm6644_vm9 = vcmask 1043456  }
 0x102   : > { %3846 = vmatprep.subr.msk.bf16.mxu0 %vm6641_vm1, %v4260_v13  ;;  %vm3851_vm8 = vmpackc.low %vm743_vm15, %vm726_vm14  ;;  %vm524_vm14 = vcmp.eq.s32.totalorder %v4554_v22, %v5515_v33  ;;  %vm288_vm15 = vcmp.eq.s32.totalorder %v4434_v1, %v5793_v63 }
 0x103   : > { %vm3879_vm12 = vmpackc.low %vm507_vm6, %vm490_vm7  ;;  %vm559_vm7 = vcmp.eq.s32.totalorder %v4572_v26, %v5502_v9  ;;  %vm576_vm6 = vcmp.eq.s32.totalorder %v4575_v27, %v5502_v9 }
 0x104   : > { %3876 = vmatpush1.bf16.msk.msra.mxu1 %vm3875_vm2, %v4260_v13  ;;  %vm3881_vm1 = vmpackc.low %vm542_vm3, %vm525_vm5  ;;  %vm305_vm2 = vcmp.eq.s32.totalorder %v4439_v4, %v5793_v63  ;;  %vm323_vm5 = vcmp.eq.s32.totalorder %v4445_v6, %v5781_v62  ;;  %vm340_vm3 = vcmp.eq.s32.totalorder %v4448_v7, %v5781_v62 }
 0x105   : > { %3848 = vmatpush1.bf16.msk.msra.mxu0 %vm5755_vm13, %v4260_v13  ;;  %3878 = vmatprep.subr.msk.bf16.mxu1 %vm3877_vm10, %v4260_v13  ;;  %vm760_vm13 = vcmp.eq.s32.totalorder %v4812_v52, %v5298_v58  ;;  %vm5823_vm10 = vmpackc.low %vm306_vm0, %vm289_vm11  ;;  %vm558_vm0 = vcmp.eq.s32.totalorder %v4572_v26, %v5515_v33 }
 0x106   : > { %3850 = vmatprep.subr.msk.bf16.mxu0 %vm5766_vm4, %v4260_v13  ;;  %vm541_vm4 = vcmp.eq.s32.totalorder %v4561_v23, %v5515_v33  ;;  %v6643_v51 = vsel %vm5823_vm10, 4294967295, %v6642_v51  ;;  %v3057_v57 = vsel %vm760_vm13, 1.0, %v4261_v56  ;;  %vm5839_vm11 = vmpackc.low %vm305_vm2, %vm288_vm15  ;;  %vm610_vm10 = vcmp.eq.s32.totalorder %v4605_v31, %v5502_v9 }
 0x107   : > { %vm3885_vm13 = vmpackc.low %vm576_vm6, %vm559_vm7  ;;  %vm339_vm15 = vcmp.eq.s32.totalorder %v4448_v7, %v5793_v63  ;;  %vm6648_vm2 = vnez %v6643_v51  ;;  %vm357_vm7 = vcmp.eq.s32.totalorder %v4463_v11, %v5781_v62  ;;  %vm374_vm6 = vcmp.eq.s32.totalorder %v4466_v12, %v5781_v62 }
 0x108   : > { %3880 = vmatpush1.bf16.msk.msra.mxu1 %vm3879_vm12, %v4260_v13  ;;  %vm575_vm12 = vcmp.eq.s32.totalorder %v4575_v27, %v5515_v33 }
 0x109   : > { %3852 = vmatpush1.bf16.msk.msra.mxu0 %vm3851_vm8, %v4260_v13  ;;  %3882 = vmatprep.subr.msk.bf16.mxu1 %vm3881_vm1, %v4260_v13  ;;  %vm3883_vm8 = vmpackc.low %vm541_vm4, %vm524_vm14  ;;  %vm6647_vm1 = vcmask 1043456   ;;  %vm322_vm4 = vcmp.eq.s32.totalorder %v4445_v6, %v5793_v63 }
 0x10a   : > { %3358 = vmatprep.subr.msk.mxu0 %vm6644_vm9, %v3058_v50  ;;  %vm593_vm9 = vcmp.eq.s32.totalorder %v4602_v30, %v5502_v9  ;;  %vm3913_vm14 = vmpackc.low %vm340_vm3, %vm323_vm5 }
 0x10b   : > { %vm3887_vm5 = vmpackc.low %vm575_vm12, %vm558_vm0  ;;  %vm627_vm0 = vcmp.eq.s32.totalorder %v4634_v34, %v5502_v9  ;;  %vm644_vm12 = vcmp.eq.s32.totalorder %v4637_v35, %v5502_v9 }
 0x10c   : > { %3884 = vmatpush1.bf16.msk.msra.mxu1 %vm3883_vm8, %v4260_v13  ;;  %vm3889_vm3 = vmpackc.low %vm610_vm10, %vm593_vm9  ;;  %vm592_vm8 = vcmp.eq.s32.totalorder %v4602_v30, %v5515_v33  ;;  %vm356_vm10 = vcmp.eq.s32.totalorder %v4463_v11, %v5793_v63  ;;  %vm373_vm9 = vcmp.eq.s32.totalorder %v4466_v12, %v5793_v63 }
 0x10d   : > { %3359 = vmatpush1.msk.msra.mxu0 %vm6647_vm1, %v3057_v57  ;;  %3886 = vmatprep.subr.msk.bf16.mxu1 %vm3885_vm13, %v4260_v13  ;;  %vm609_vm1 = vcmp.eq.s32.totalorder %v4605_v31, %v5515_v33  ;;  %vm3917_vm13 = vmpackc.low %vm374_vm6, %vm357_vm7  ;;  %vm626_vm6 = vcmp.eq.s32.totalorder %v4634_v34, %v5515_v33 }
 0x10e   : > { %2162 = vmatmul.mubr.f32.vlgmr.msra.gmra.mrb[4].mxu0 %v4909_v61  ;;  %3910 = vmatprep.subr.msk.bf16.mxu0 %vm6648_vm2, %v4260_v13  ;;  %vm3915_vm2 = vmpackc.low %vm339_vm15, %vm322_vm4  ;;  %vm408_vm4 = vcmp.eq.s32.totalorder %v4497_v15, %v5781_v62 }
 0x10f   : > { %3912 = vmatpush1.bf16.msk.msra.mxu0 %vm5839_vm11, %v4260_v13  ;;  %vm6649_vm11 = vcmask 818176   ;;  %vm3891_vm15 = vmpackc.low %vm609_vm1, %vm592_vm8  ;;  %vm678_vm1 = vcmp.eq.s32.totalorder %v4678_v39, %v5502_v9 }
 0x110   : > { %3914 = vmatprep.subr.msk.bf16.mxu0 %vm3913_vm14, %v4260_v13  ;;  %3478 = vmatprep.mubr.msk.f32.mxu0 %vm6649_vm11, %v5647_v45  ;;  %vm391_vm14 = vcmp.eq.s32.totalorder %v4494_v14, %v5781_v62  ;;  %vm3893_vm7 = vmpackc.low %vm644_vm12, %vm627_vm0  ;;  %vm643_vm11 = vcmp.eq.s32.totalorder %v4637_v35, %v5515_v33  ;;  %vm407_vm0 = vcmp.eq.s32.totalorder %v4497_v15, %v5793_v63 }
 0x111   : > { %3888 = vmatpush1.bf16.msk.msra.mxu1 %vm3887_vm5, %v4260_v13  ;;  %vm3919_vm5 = vmpackc.low %vm373_vm9, %vm356_vm10  ;;  %vm425_vm12 = vcmp.eq.s32.totalorder %v4510_v16, %v5781_v62 }
 0x112   : > { %3890 = vmatprep.subr.msk.bf16.mxu1 %vm3889_vm3, %v4260_v13  ;;  %vm661_vm3 = vcmp.eq.s32.totalorder %v4675_v38, %v5502_v9  ;;  %vm3921_vm8 = vmpackc.low %vm408_vm4, %vm391_vm14  ;;  %vm660_vm14 = vcmp.eq.s32.totalorder %v4675_v38, %v5515_v33  ;;  %vm677_vm4 = vcmp.eq.s32.totalorder %v4678_v39, %v5515_v33 }
 0x113   : > { %3916 = vmatpush1.bf16.msk.msra.mxu0 %vm3915_vm2, %v4260_v13  ;;  %vm390_vm2 = vcmp.eq.s32.totalorder %v4494_v14, %v5793_v63  ;;  %vm3895_vm10 = vmpackc.low %vm643_vm11, %vm626_vm6  ;;  %vm712_vm6 = vcmp.eq.s32.totalorder %v4722_v43, %v5502_v9 }
 0x114   : > { %3918 = vmatprep.subr.msk.bf16.mxu0 %vm3917_vm13, %v4260_v13  ;;  %vm442_vm13 = vcmp.eq.s32.totalorder %v4513_v17, %v5781_v62  ;;  %vm3897_vm9 = vmpackc.low %vm678_vm1, %vm661_vm3  ;;  %vm441_vm3 = vcmp.eq.s32.totalorder %v4513_v17, %v5793_v63  ;;  %vm459_vm1 = vcmp.eq.s32.totalorder %v4526_v18, %v5781_v62 }
 0x115   : > { %3892 = vmatpush1.bf16.msk.msra.mxu1 %vm3891_vm15, %v4260_v13  ;;  %vm3923_vm15 = vmpackc.low %vm407_vm0, %vm390_vm2 }
 0x116   : > { %3894 = vmatprep.subr.msk.bf16.mxu1 %vm3893_vm7, %v4260_v13  ;;  %vm695_vm7 = vcmp.eq.s32.totalorder %v4719_v42, %v5502_v9  ;;  %vm3925_vm11 = vmpackc.low %vm442_vm13, %vm425_vm12  ;;  %vm694_vm12 = vcmp.eq.s32.totalorder %v4719_v42, %v5515_v33  ;;  %vm711_vm13 = vcmp.eq.s32.totalorder %v4722_v43, %v5515_v33 }
 0x117   : > { %3920 = vmatpush1.bf16.msk.msra.mxu0 %vm3919_vm5, %v4260_v13  ;;  %vm424_vm5 = vcmp.eq.s32.totalorder %v4510_v16, %v5793_v63  ;;  %vm3899_vm2 = vmpackc.low %vm677_vm4, %vm660_vm14  ;;  %vm746_vm4 = vcmp.eq.s32.totalorder %v4766_v47, %v5502_v9 }
 0x118   : > { %3922 = vmatprep.subr.msk.bf16.mxu0 %vm3921_vm8, %v4260_v13  ;;  %vm476_vm8 = vcmp.eq.s32.totalorder %v4529_v19, %v5781_v62  ;;  %vm3901_vm0 = vmpackc.low %vm712_vm6, %vm695_vm7  ;;  %vm475_vm7 = vcmp.eq.s32.totalorder %v4529_v19, %v5793_v63  ;;  %vm493_vm6 = vcmp.eq.s32.totalorder %v4542_v20, %v5781_v62 }
 0x119   : > { %3896 = vmatpush1.bf16.msk.msra.mxu1 %vm3895_vm10, %v4260_v13  ;;  %vm3927_vm10 = vmpackc.low %vm441_vm3, %vm424_vm5 }
 0x11a   : > { %3898 = vmatprep.subr.msk.bf16.mxu1 %vm3897_vm9, %v4260_v13  ;;  %vm729_vm9 = vcmp.eq.s32.totalorder %v4763_v46, %v5502_v9  ;;  %vm3929_vm14 = vmpackc.low %vm476_vm8, %vm459_vm1  ;;  %vm728_vm1 = vcmp.eq.s32.totalorder %v4763_v46, %v5515_v33  ;;  %vm745_vm8 = vcmp.eq.s32.totalorder %v4766_v47, %v5515_v33 }
 0x11b   : > { %3924 = vmatpush1.bf16.msk.msra.mxu0 %vm3923_vm15, %v4260_v13  ;;  %vm458_vm15 = vcmp.eq.s32.totalorder %v4526_v18, %v5793_v63  ;;  %vm3903_vm5 = vmpackc.low %vm711_vm13, %vm694_vm12  ;;  %vm509_vm12 = vcmp.eq.s32.totalorder %v4545_v21, %v5793_v63  ;;  %vm763_vm13 = vcmp.eq.s32.totalorder %v4812_v52, %v5502_v9 }
 0x11c   : > { %3926 = vmatprep.subr.msk.bf16.mxu0 %vm3925_vm11, %v4260_v13  ;;  %vm510_vm11 = vcmp.eq.s32.totalorder %v4545_v21, %v5781_v62  ;;  %vm5951_vm3 = vmpackc.low %vm746_vm4, %vm729_vm9  ;;  %vm527_vm9 = vcmp.eq.s32.totalorder %v4554_v22, %v5781_v62  ;;  %vm544_vm4 = vcmp.eq.s32.totalorder %v4561_v23, %v5781_v62  ;;  %v3060_v32 = vsel %vm763_vm13, 1.0, %v4261_v56 }
 0x11d   : > { %3900 = vmatpush1.bf16.msk.msra.mxu1 %vm3899_vm2, %v4260_v13  ;;  %vm3931_vm2 = vmpackc.low %vm475_vm7, %vm458_vm15  ;;  %vm543_vm15 = vcmp.eq.s32.totalorder %v4561_v23, %v5793_v63  ;;  %vm307_vm13 = vcmp.eq.s32.totalorder %v4439_v4, %v5979_v0 }
 0x11e   : > { %3902 = vmatprep.subr.msk.bf16.mxu1 %vm3901_vm0, %v4260_v13  ;;  %vm492_vm0 = vcmp.eq.s32.totalorder %v4542_v20, %v5793_v63  ;;  %vm3907_vm7 = vmpackc.low %vm745_vm8, %vm728_vm1  ;;  %vm291_vm8 = vcmp.eq.s32.totalorder %v4434_v1, %v5969_v8 }
 0x11f   : > { %3928 = vmatpush1.bf16.msk.msra.mxu0 %vm3927_vm10, %v4260_v13  ;;  %vm3933_vm10 = vmpackc.low %vm510_vm11, %vm493_vm6  ;;  %vm561_vm11 = vcmp.eq.s32.totalorder %v4572_v26, %v5781_v62 }
 0x120   : > { %3930 = vmatprep.subr.msk.bf16.mxu0 %vm3929_vm14, %v4260_v13  ;;  %vm526_vm14 = vcmp.eq.s32.totalorder %v4554_v22, %v5793_v63  ;;  %vm5995_vm6 = vmpackc.low %vm509_vm12, %vm492_vm0  ;;  %vm290_vm12 = vcmp.eq.s32.totalorder %v4434_v1, %v5979_v0 }
 0x121   : > { %3904 = vmatpush1.bf16.msk.msra.mxu1 %vm3903_vm5, %v4260_v13  ;;  %vm578_vm5 = vcmp.eq.s32.totalorder %v4575_v27, %v5781_v62  ;;  %vm6010_vm1 = vmpackc.low %vm544_vm4, %vm527_vm9  ;;  %vm6660_vm9 = vcmask 1043456   ;;  %vm325_vm4 = vcmp.eq.s32.totalorder %v4445_v6, %v5969_v8 }
 0x122   : > { %3906 = vmatprep.subr.msk.bf16.mxu1 %vm5951_vm3, %v4260_v13  ;;  %vm762_vm3 = vcmp.eq.s32.totalorder %v4812_v52, %v5515_v33  ;;  %vm6018_vm0 = vmpackc.low %vm543_vm15, %vm526_vm14  ;;  %v6658_v33 = vmov 0  ;;  %vm342_vm14 = vcmp.eq.s32.totalorder %v4448_v7, %v5969_v8  ;;  %vm560_vm15 = vcmp.eq.s32.totalorder %v4572_v26, %v5793_v63 }
 0x123   : > { %3932 = vmatpush1.bf16.msk.msra.mxu0 %vm3931_vm2, %v4260_v13  ;;  %vm308_vm2 = vcmp.eq.s32.totalorder %v4439_v4, %v5969_v8  ;;  %v3059_v24 = vsel %vm762_vm3, 1.0, %v4261_v56  ;;  %vm612_vm3 = vcmp.eq.s32.totalorder %v4605_v31, %v5781_v62 }
 0x124   : > { %3934 = vmatprep.subr.msk.bf16.mxu0 %vm3933_vm10, %v4260_v13  ;;  %vm6027_vm10 = vmpackc.low %vm578_vm5, %vm561_vm11  ;;  %vm595_vm5 = vcmp.eq.s32.totalorder %v4602_v30, %v5781_v62 }
 0x125   : > { %3908 = vmatpush1.bf16.msk.msra.mxu1 %vm3907_vm7, %v4260_v13  ;;  %v6659_v33 = vsel %vm6027_vm10, 4294967295, %v6658_v33  ;;  %vm577_vm7 = vcmp.eq.s32.totalorder %v4575_v27, %v5793_v63  ;;  %vm3965_vm11 = vmpackc.low %vm308_vm2, %vm291_vm8  ;;  %vm6661_vm10 = vcmask 1043456   ;;  %vm324_vm8 = vcmp.eq.s32.totalorder %v4445_v6, %v5979_v0 }
 0x126   : > { %3417 = vmatprep.subr.msk.mxu1 %vm6660_vm9, %v3060_v32  ;;  %vm3967_vm9 = vmpackc.low %vm307_vm13, %vm290_vm12  ;;  %vm341_vm2 = vcmp.eq.s32.totalorder %v4448_v7, %v5979_v0  ;;  %vm359_vm12 = vcmp.eq.s32.totalorder %v4463_v11, %v5969_v8  ;;  %vm376_vm13 = vcmp.eq.s32.totalorder %v4466_v12, %v5969_v8 }
 0x127   : > { %3936 = vmatpush1.bf16.msk.msra.mxu0 %vm5995_vm6, %v4260_v13  ;;  %vm6052_vm6 = vmpackc.low %vm342_vm14, %vm325_vm4  ;;  %vm594_vm4 = vcmp.eq.s32.totalorder %v4602_v30, %v5793_v63  ;;  %vm611_vm14 = vcmp.eq.s32.totalorder %v4605_v31, %v5793_v63 }
 0x128   : > { %3938 = vmatprep.subr.msk.bf16.mxu0 %vm6010_vm1, %v4260_v13  ;;  %vm6060_vm1 = vmpackc.low %vm577_vm7, %vm560_vm15  ;;  %vm6668_vm15 = vnez %v6659_v33  ;;  %vm629_vm7 = vcmp.eq.s32.totalorder %v4634_v34, %v5781_v62 }
 0x129   : > { %3418 = vmatpush1.msk.msra.mxu1 %vm6661_vm10, %v3059_v24  ;;  %vm6075_vm10 = vmpackc.low %vm612_vm3, %vm595_vm5  ;;  %vm358_vm3 = vcmp.eq.s32.totalorder %v4463_v11, %v5979_v0 }
 0x12a   : > { %3966 = vmatprep.subr.msk.bf16.mxu1 %vm3965_vm11, %v4260_v13  ;;  %2233 = vmatmul.mubr.f32.vlgmr.msra.gmra.mrb[4].mxu1 %v6065_v37  ;;  %v6667_v40 = vsel %vm6075_vm10, 4294967295, %v6666_v40  ;;  %vm3971_vm11 = vmpackc.low %vm341_vm2, %vm324_vm8  ;;  %vm410_vm8 = vcmp.eq.s32.totalorder %v4497_v15, %v5969_v8 }
 0x12b   : > { %3940 = vmatpush1.bf16.msk.msra.mxu0 %vm6018_vm0, %v4260_v13  ;;  %3968 = vmatpush1.bf16.msk.msra.mxu1 %vm3967_vm9, %v4260_v13  ;;  %vm646_vm0 = vcmp.eq.s32.totalorder %v4637_v35, %v5781_v62  ;;  %vm3973_vm5 = vmpackc.low %vm376_vm13, %vm359_vm12  ;;  %vm375_vm9 = vcmp.eq.s32.totalorder %v4466_v12, %v5979_v0  ;;  %vm628_vm12 = vcmp.eq.s32.totalorder %v4634_v34, %v5793_v63 }
 0x12c   : > { %3942 = vmatprep.subr.msk.bf16.mxu0 %vm6668_vm15, %v4260_v13  ;;  %3970 = vmatprep.subr.msk.bf16.mxu1 %vm6052_vm6, %v4260_v13  ;;  %vm6669_vm15 = vcmask 818176   ;;  %vm6106_vm10 = vmpackc.low %vm611_vm14, %vm594_vm4  ;;  %vm393_vm6 = vcmp.eq.s32.totalorder %v4494_v14, %v5969_v8  ;;  %vm645_vm13 = vcmp.eq.s32.totalorder %v4637_v35, %v5793_v63  ;;  %vm6674_vm4 = vnez %v6667_v40 }
 0x12d   : > { %3537 = vmatprep.mubr.msk.f32.mxu1 %vm6669_vm15, %v5647_v45  ;;  %vm6117_vm2 = vmpackc.low %vm646_vm0, %vm629_vm7  ;;  %vm663_vm14 = vcmp.eq.s32.totalorder %v4675_v38, %v5781_v62  ;;  %vm409_vm15 = vcmp.eq.s32.totalorder %v4497_v15, %v5979_v0 }
 0x12e   : > { %v6673_v28 = vsel %vm6117_vm2, 4294967295, %v6672_v28  ;;  %vm3975_vm7 = vmpackc.low %vm375_vm9, %vm358_vm3  ;;  %vm427_vm2 = vcmp.eq.s32.totalorder %v4510_v16, %v5969_v8  ;;  %vm662_vm9 = vcmp.eq.s32.totalorder %v4675_v38, %v5793_v63 }
 0x12f   : > { %3944 = vmatpush1.bf16.msk.msra.mxu0 %vm6060_vm1, %v4260_v13  ;;  %3972 = vmatpush1.bf16.msk.msra.mxu1 %vm3971_vm11, %v4260_v13  ;;  %vm680_vm1 = vcmp.eq.s32.totalorder %v4678_v39, %v5781_v62  ;;  %vm3977_vm0 = vmpackc.low %vm410_vm8, %vm393_vm6  ;;  %vm392_vm11 = vcmp.eq.s32.totalorder %v4494_v14, %v5979_v0  ;;  %vm679_vm6 = vcmp.eq.s32.totalorder %v4678_v39, %v5793_v63 }
 0x130   : > { %3946 = vmatprep.subr.msk.bf16.mxu0 %vm6674_vm4, %v4260_v13  ;;  %3974 = vmatprep.subr.msk.bf16.mxu1 %vm3973_vm5, %v4260_v13  ;;  %vm6141_vm4 = vmpackc.low %vm645_vm13, %vm628_vm12  ;;  %vm444_vm5 = vcmp.eq.s32.totalorder %v4513_v17, %v5969_v8  ;;  %vm6679_vm8 = vnez %v6673_v28  ;;  %vm697_vm12 = vcmp.eq.s32.totalorder %v4719_v42, %v5781_v62 }
 0x131   : > { %v6676_v29 = vsel %vm6141_vm4, 4294967295, %v6675_v29  ;;  %vm6152_vm3 = vmpackc.low %vm680_vm1, %vm663_vm14  ;;  %vm426_vm1 = vcmp.eq.s32.totalorder %v4510_v16, %v5979_v0  ;;  %vm478_vm4 = vcmp.eq.s32.totalorder %v4529_v19, %v5969_v8 }
 0x132   : > { %v6678_v41 = vsel %vm6152_vm3, 4294967295, %v6677_v41  ;;  %vm3979_vm13 = vmpackc.low %vm409_vm15, %vm392_vm11  ;;  %vm696_vm11 = vcmp.eq.s32.totalorder %v4719_v42, %v5793_v63  ;;  %vm713_vm15 = vcmp.eq.s32.totalorder %v4722_v43, %v5793_v63 }
 0x133   : > { %3948 = vmatpush1.bf16.msk.msra.mxu0 %vm6106_vm10, %v4260_v13  ;;  %3976 = vmatpush1.bf16.msk.msra.mxu1 %vm3975_vm7, %v4260_v13  ;;  %vm714_vm10 = vcmp.eq.s32.totalorder %v4722_v43, %v5781_v62  ;;  %vm3981_vm14 = vmpackc.low %vm444_vm5, %vm427_vm2  ;;  %vm443_vm7 = vcmp.eq.s32.totalorder %v4513_v17, %v5979_v0  ;;  %vm6685_vm5 = vnez %v6678_v41 }
 0x134   : > { %3950 = vmatprep.subr.msk.bf16.mxu0 %vm6679_vm8, %v4260_v13  ;;  %3978 = vmatprep.subr.msk.bf16.mxu1 %vm3977_vm0, %v4260_v13  ;;  %vm6173_vm3 = vmpackc.low %vm679_vm6, %vm662_vm9  ;;  %vm461_vm8 = vcmp.eq.s32.totalorder %v4526_v18, %v5969_v8  ;;  %vm6682_vm0 = vnez %v6676_v29  ;;  %vm731_vm9 = vcmp.eq.s32.totalorder %v4763_v46, %v5781_v62  ;;  %vm748_vm6 = vcmp.eq.s32.totalorder %v4766_v47, %v5781_v62 }
 0x135   : > { %v6681_v44 = vsel %vm6173_vm3, 4294967295, %v6680_v44  ;;  %vm6184_vm2 = vmpackc.low %vm714_vm10, %vm697_vm12  ;;  %vm512_vm3 = vcmp.eq.s32.totalorder %v4545_v21, %v5969_v8 }
 0x136   : > { %v6684_v48 = vsel %vm6184_vm2, 4294967295, %v6683_v48  ;;  %vm3983_vm12 = vmpackc.low %vm443_vm7, %vm426_vm1  ;;  %vm730_vm7 = vcmp.eq.s32.totalorder %v4763_v46, %v5793_v63 }
 0x137   : > { %3952 = vmatpush1.bf16.msk.msra.mxu0 %vm6682_vm0, %v4260_v13  ;;  %3980 = vmatpush1.bf16.msk.msra.mxu1 %vm3979_vm13, %v4260_v13  ;;  %vm3985_vm10 = vmpackc.low %vm478_vm4, %vm461_vm8  ;;  %vm460_vm0 = vcmp.eq.s32.totalorder %v4526_v18, %v5979_v0  ;;  %vm477_vm13 = vcmp.eq.s32.totalorder %v4529_v19, %v5979_v0  ;;  %vm6691_vm1 = vnez %v6684_v48  ;;  %vm747_vm8 = vcmp.eq.s32.totalorder %v4766_v47, %v5793_v63 }
 0x138   : > { %3954 = vmatprep.subr.msk.bf16.mxu0 %vm6685_vm5, %v4260_v13  ;;  %3982 = vmatprep.subr.msk.bf16.mxu1 %vm3981_vm14, %v4260_v13  ;;  %vm6205_vm2 = vmpackc.low %vm713_vm15, %vm696_vm11  ;;  %vm495_vm5 = vcmp.eq.s32.totalorder %v4542_v20, %v5969_v8  ;;  %vm6688_vm14 = vnez %v6681_v44 }
 0x139   : > { %vm6216_vm4 = vmpackc.low %vm748_vm6, %vm731_vm9  ;;  %vm494_vm9 = vcmp.eq.s32.totalorder %v4542_v20, %v5979_v0  ;;  %vm511_vm6 = vcmp.eq.s32.totalorder %v4545_v21, %v5979_v0 }
 0x13a   : > { %vm3987_vm11 = vmpackc.low %vm477_vm13, %vm460_vm0  ;;  %vm764_vm0 = vcmp.eq.s32.totalorder %v4812_v52, %v5793_v63 }
 0x13b   : > { %3956 = vmatpush1.bf16.msk.msra.mxu0 %vm6688_vm14, %v4260_v13  ;;  %3984 = vmatpush1.bf16.msk.msra.mxu1 %vm3983_vm12, %v4260_v13  ;;  %vm3989_vm15 = vmpackc.low %vm512_vm3, %vm495_vm5  ;;  %vm765_vm12 = vcmp.eq.s32.totalorder %v4812_v52, %v5781_v62  ;;  %vm529_vm14 = vcmp.eq.s32.totalorder %v4554_v22, %v5969_v8  ;;  %vm545_vm5 = vcmp.eq.s32.totalorder %v4561_v23, %v5979_v0  ;;  %v3061_v55 = vsel %vm764_vm0, 1.0, %v4261_v56 }
 0x13c   : > { %3958 = vmatprep.subr.msk.bf16.mxu0 %vm6691_vm1, %v4260_v13  ;;  %3986 = vmatprep.subr.msk.bf16.mxu1 %vm3985_vm10, %v4260_v13  ;;  %vm546_vm1 = vcmp.eq.s32.totalorder %v4561_v23, %v5969_v8  ;;  %vm3963_vm3 = vmpackc.low %vm747_vm8, %vm730_vm7  ;;  %v3062_v54 = vsel %vm765_vm12, 1.0, %v4261_v56  ;;  %vm292_vm7 = vcmp.eq.s32.totalorder %v4434_v1, %v6243_v3  ;;  %vm563_vm8 = vcmp.eq.s32.totalorder %v4572_v26, %v5969_v8 }
 0x13d   : > { %vm3991_vm10 = vmpackc.low %vm511_vm6, %vm494_vm9  ;;  %vm562_vm12 = vcmp.eq.s32.totalorder %v4572_v26, %v5979_v0  ;;  %vm326_vm0 = vcmp.eq.s32.totalorder %v4445_v6, %v6243_v3  ;;  %v4262_v1 = vmov 0.0|0.0  }
 0x13e   : > { %vm3993_vm13 = vmpackc.low %vm546_vm1, %vm529_vm14  ;;  %vm579_vm14 = vcmp.eq.s32.totalorder %v4575_v27, %v5979_v0 }
 0x13f   : > { %3960 = vmatpush1.bf16.msk.msra.mxu0 %vm6205_vm2, %v4260_v13  ;;  %3988 = vmatpush1.bf16.msk.msra.mxu1 %vm3987_vm11, %v4260_v13  ;;  %vm528_vm2 = vcmp.eq.s32.totalorder %v4554_v22, %v5979_v0  ;;  %vm580_vm11 = vcmp.eq.s32.totalorder %v4575_v27, %v5969_v8 }
 0x140   : > { %3962 = vmatprep.subr.msk.bf16.mxu0 %vm6216_vm4, %v4260_v13  ;;  %3990 = vmatprep.subr.msk.bf16.mxu1 %vm3989_vm15, %v4260_v13  ;;  %vm309_vm4 = vcmp.eq.s32.totalorder %v4439_v4, %v6243_v3  ;;  %vm6692_vm15 = vcmask 1043456   ;;  %vm3995_vm9 = vmpackc.low %vm545_vm5, %vm528_vm2 }
 0x141   : > { %vm4022_vm6 = vmpackc.low %vm309_vm4, %vm292_vm7  ;;  %vm596_vm7 = vcmp.eq.s32.totalorder %v4602_v30, %v5979_v0  ;;  %vm613_vm4 = vcmp.eq.s32.totalorder %v4605_v31, %v5979_v0 }
 0x142   : > { %vm3997_vm1 = vmpackc.low %vm580_vm11, %vm563_vm8  ;;  %vm631_vm11 = vcmp.eq.s32.totalorder %v4634_v34, %v5969_v8 }
 0x143   : > { %3964 = vmatpush1.bf16.msk.msra.mxu0 %vm3963_vm3, %v4260_v13  ;;  %3992 = vmatpush1.bf16.msk.msra.mxu1 %vm3991_vm10, %v4260_v13  ;;  %vm597_vm3 = vcmp.eq.s32.totalorder %v4602_v30, %v5969_v8  ;;  %vm614_vm10 = vcmp.eq.s32.totalorder %v4605_v31, %v5969_v8  ;;  %vm3999_vm2 = vmpackc.low %vm579_vm14, %vm562_vm12  ;;  %vm360_vm12 = vcmp.eq.s32.totalorder %v4463_v11, %v6243_v3 }
 0x144   : > { %3476 = vmatprep.subr.msk.mxu0 %vm6692_vm15, %v3062_v54  ;;  %3994 = vmatprep.subr.msk.bf16.mxu1 %vm3993_vm13, %v4260_v13  ;;  %vm343_vm13 = vcmp.eq.s32.totalorder %v4448_v7, %v6243_v3  ;;  %vm4001_vm5 = vmpackc.low %vm614_vm10, %vm597_vm3  ;;  %vm377_vm14 = vcmp.eq.s32.totalorder %v4466_v12, %v6243_v3  ;;  %vm630_vm10 = vcmp.eq.s32.totalorder %v4634_v34, %v5979_v0 }
 0x145   : > { %vm4025_vm8 = vmpackc.low %vm343_vm13, %vm326_vm0  ;;  %vm665_vm13 = vcmp.eq.s32.totalorder %v4675_v38, %v5969_v8 }
 0x146   : > { %vm4028_vm0 = vmpackc.low %vm377_vm14, %vm360_vm12  ;;  %vm699_vm12 = vcmp.eq.s32.totalorder %v4719_v42, %v5969_v8  ;;  %vm716_vm14 = vcmp.eq.s32.totalorder %v4722_v43, %v5969_v8 }
 0x147   : > { %3477 = vmatpush1.msk.msra.mxu0 %vm6692_vm15, %v3061_v55  ;;  %3996 = vmatpush1.bf16.msk.msra.mxu1 %vm3995_vm9, %v4260_v13  ;;  %vm648_vm9 = vcmp.eq.s32.totalorder %v4637_v35, %v5969_v8  ;;  %vm647_vm15 = vcmp.eq.s32.totalorder %v4637_v35, %v5979_v0 }
 0x148   : > { %2304 = vmatmul.mubr.f32.vlgmr.msra.gmra.mrb[6].mxu0 %v6065_v37  ;;  %4021 = vmatprep.subr.bf16.mxu0 %v4262_v1  ;;  %vm4005_vm3 = vmpackc.low %vm648_vm9, %vm631_vm11  ;;  %vm664_vm11 = vcmp.eq.s32.totalorder %v4675_v38, %v5979_v0  ;;  %vm681_vm9 = vcmp.eq.s32.totalorder %v4678_v39, %v5979_v0 }
 0x149   : > { %4023 = vmatpush1.bf16.msk.msra.mxu0 %vm4022_vm6, %v4260_v13  ;;  %3998 = vmatprep.subr.msk.bf16.mxu1 %vm3997_vm1, %v4260_v13  ;;  %vm6693_vm6 = vcmask 818176   ;;  %vm4003_vm1 = vmpackc.low %vm613_vm4, %vm596_vm7  ;;  %vm411_vm7 = vcmp.eq.s32.totalorder %v4497_v15, %v6243_v3 }
 0x14a   : > { %4024 = vmatprep.subr.bf16.mxu0 %v4262_v1  ;;  %3567 = vmatprep.mubr.msk.f32.mxu0 %vm6693_vm6, %v5647_v45  ;;  %vm4007_vm4 = vmpackc.low %vm647_vm15, %vm630_vm10 }
 0x14b   : > { %4000 = vmatpush1.bf16.msk.msra.mxu1 %vm3999_vm2, %v4260_v13  ;;  %vm682_vm2 = vcmp.eq.s32.totalorder %v4678_v39, %v5969_v8  ;;  %vm4011_vm10 = vmpackc.low %vm681_vm9, %vm664_vm11 }
 0x14c   : > { %4002 = vmatprep.subr.msk.bf16.mxu1 %vm4001_vm5, %v4260_v13  ;;  %vm394_vm5 = vcmp.eq.s32.totalorder %v4494_v14, %v6243_v3  ;;  %vm4013_vm15 = vmpackc.low %vm716_vm14, %vm699_vm12  ;;  %vm749_vm12 = vcmp.eq.s32.totalorder %v4766_v47, %v5979_v0 }
 0x14d   : > { %4026 = vmatpush1.bf16.msk.msra.mxu0 %vm4025_vm8, %v4260_v13  ;;  %vm4009_vm8 = vmpackc.low %vm682_vm2, %vm665_vm13  ;;  %vm715_vm13 = vcmp.eq.s32.totalorder %v4722_v43, %v5979_v0 }
 0x14e   : > { %4027 = vmatprep.subr.bf16.mxu0 %v4262_v1  ;;  %vm4031_vm6 = vmpackc.low %vm411_vm7, %vm394_vm5  ;;  %vm733_vm5 = vcmp.eq.s32.totalorder %v4763_v46, %v5969_v8  ;;  %vm750_vm7 = vcmp.eq.s32.totalorder %v4766_v47, %v5969_v8 }
 0x14f   : > { %4004 = vmatpush1.bf16.msk.msra.mxu1 %vm4003_vm1, %v4260_v13  ;;  %vm428_vm1 = vcmp.eq.s32.totalorder %v4510_v16, %v6243_v3  ;;  %vm4017_vm9 = vmpackc.low %vm750_vm7, %vm733_vm5  ;;  %vm547_vm5 = vcmp.eq.s32.totalorder %v4561_v23, %v6243_v3  ;;  %vm6694_vm7 = vcmask 1043456  }
 0x150   : > { %4006 = vmatprep.subr.msk.bf16.mxu1 %vm4005_vm3, %v4260_v13  ;;  %vm445_vm3 = vcmp.eq.s32.totalorder %v4513_v17, %v6243_v3 }
 0x151   : > { %4029 = vmatpush1.bf16.msk.msra.mxu0 %vm4028_vm0, %v4260_v13  ;;  %vm698_vm0 = vcmp.eq.s32.totalorder %v4719_v42, %v5979_v0  ;;  %vm4034_vm2 = vmpackc.low %vm445_vm3, %vm428_vm1  ;;  %vm767_vm1 = vcmp.eq.s32.totalorder %v4812_v52, %v5969_v8  ;;  %vm496_vm3 = vcmp.eq.s32.totalorder %v4542_v20, %v6243_v3 }
 0x152   : > { %4030 = vmatprep.subr.bf16.mxu0 %v4262_v1  ;;  %vm4015_vm11 = vmpackc.low %vm715_vm13, %vm698_vm0  ;;  %v3064_v4 = vsel %vm767_vm1, 1.0, %v4261_v56  ;;  %vm766_vm0 = vcmp.eq.s32.totalorder %v4812_v52, %v5979_v0 }
 0x153   : > { %4008 = vmatpush1.bf16.msk.msra.mxu1 %vm4007_vm4, %v4260_v13  ;;  %vm462_vm4 = vcmp.eq.s32.totalorder %v4526_v18, %v6243_v3  ;;  %v3063_v6 = vsel %vm766_vm0, 1.0, %v4261_v56  ;;  %vm666_vm0 = vcmp.eq.s32.totalorder %v4675_v38, %v6243_v3 }
 0x154   : > { %4010 = vmatprep.subr.msk.bf16.mxu1 %vm4009_vm8, %v4260_v13  ;;  %vm479_vm8 = vcmp.eq.s32.totalorder %v4529_v19, %v6243_v3 }
 0x155   : > { %4032 = vmatpush1.bf16.msk.msra.mxu0 %vm4031_vm6, %v4260_v13  ;;  %vm732_vm6 = vcmp.eq.s32.totalorder %v4763_v46, %v5979_v0  ;;  %vm4037_vm14 = vmpackc.low %vm479_vm8, %vm462_vm4  ;;  %vm564_vm8 = vcmp.eq.s32.totalorder %v4572_v26, %v6243_v3 }
 0x156   : > { %4033 = vmatprep.subr.bf16.mxu0 %v4262_v1 }
 0x157   : > { %4012 = vmatpush1.bf16.msk.msra.mxu1 %vm4011_vm10, %v4260_v13  ;;  %vm513_vm10 = vcmp.eq.s32.totalorder %v4545_v21, %v6243_v3 }
 0x158   : > { %4014 = vmatprep.subr.msk.bf16.mxu1 %vm4013_vm15, %v4260_v13  ;;  %vm4019_vm15 = vmpackc.low %vm749_vm12, %vm732_vm6  ;;  %vm598_vm12 = vcmp.eq.s32.totalorder %v4602_v30, %v6243_v3 }
 0x159   : > { %4035 = vmatpush1.bf16.msk.msra.mxu0 %vm4034_vm2, %v4260_v13  ;;  %vm4040_vm13 = vmpackc.low %vm513_vm10, %vm496_vm3  ;;  %vm530_vm2 = vcmp.eq.s32.totalorder %v4554_v22, %v6243_v3  ;;  %vm632_vm3 = vcmp.eq.s32.totalorder %v4634_v34, %v6243_v3  ;;  %vm649_vm10 = vcmp.eq.s32.totalorder %v4637_v35, %v6243_v3 }
 0x15a   : > { %4036 = vmatprep.subr.bf16.mxu0 %v4262_v1  ;;  %vm4043_vm4 = vmpackc.low %vm547_vm5, %vm530_vm2  ;;  %vm700_vm5 = vcmp.eq.s32.totalorder %v4719_v42, %v6243_v3 }
 0x15b   : > { %4016 = vmatpush1.bf16.msk.msra.mxu1 %vm4015_vm11, %v4260_v13  ;;  %vm581_vm11 = vcmp.eq.s32.totalorder %v4575_v27, %v6243_v3 }
 0x15c   : > { %4018 = vmatprep.subr.msk.bf16.mxu1 %vm4017_vm9, %v4260_v13  ;;  %vm6695_vm9 = vmmov %vm6694_vm7 }
 0x15d   : > { %4038 = vmatpush1.bf16.msk.msra.mxu0 %vm4037_vm14, %v4260_v13  ;;  %vm4046_vm6 = vmpackc.low %vm581_vm11, %vm564_vm8  ;;  %vm615_vm14 = vcmp.eq.s32.totalorder %v4605_v31, %v6243_v3  ;;  %vm734_vm8 = vcmp.eq.s32.totalorder %v4763_v46, %v6243_v3  ;;  %vm751_vm11 = vcmp.eq.s32.totalorder %v4766_v47, %v6243_v3 }
 0x15e   : > { %4039 = vmatprep.subr.bf16.mxu0 %v4262_v1  ;;  %vm4049_vm1 = vmpackc.low %vm615_vm14, %vm598_vm12  ;;  %vm6696_vm12 = vcmask 1043456  }
 0x15f   : > { %4020 = vmatpush1.bf16.msk.msra.mxu1 %vm4019_vm15, %v4260_v13  ;;  %vm4052_vm15 = vmpackc.low %vm649_vm10, %vm632_vm3 }
 0x160   : > { %3535 = vmatprep.subr.msk.mxu1 %vm6694_vm7, %v3064_v4  ;;  %vm717_vm7 = vcmp.eq.s32.totalorder %v4722_v43, %v6243_v3 }
 0x161   : > { %4041 = vmatpush1.bf16.msk.msra.mxu0 %vm4040_vm13, %v4260_v13  ;;  %vm683_vm13 = vcmp.eq.s32.totalorder %v4678_v39, %v6243_v3 }
 0x162   : > { %4042 = vmatprep.subr.bf16.mxu0 %v4262_v1  ;;  %vm4055_vm2 = vmpackc.low %vm683_vm13, %vm666_vm0 }
 0x163   : > { %3536 = vmatpush1.msk.msra.mxu1 %vm6695_vm9, %v3063_v6  ;;  %vm4061_vm9 = vmpackc.low %vm751_vm11, %vm734_vm8 }
 0x164   : > { %2375 = vmatmul.mubr.f32.vlgmr.msra.gmra.mrb[6].mxu1 %v6065_v37 }
 0x165   : > { %4044 = vmatpush1.bf16.msk.msra.mxu0 %vm4043_vm4, %v4260_v13  ;;  %vm4058_vm4 = vmpackc.low %vm717_vm7, %vm700_vm5 }
 0x166   : > { %4045 = vmatprep.subr.bf16.mxu0 %v4262_v1 }
 0x169   : > { %4047 = vmatpush1.bf16.msk.msra.mxu0 %vm4046_vm6, %v4260_v13  ;;  %vm768_vm6 = vcmp.eq.s32.totalorder %v4812_v52, %v6243_v3 }
 0x16a   : > { %4048 = vmatprep.subr.bf16.mxu0 %v4262_v1  ;;  %v3065_v12 = vsel %vm768_vm6, 1.0, %v4261_v56 }
 0x16d   : > { %v1879_v7 = vpop.f32.mrb[0].mxu0  ;;  %4050 = vmatpush1.bf16.msk.msra.mxu0 %vm4049_vm1, %v4260_v13 }
 0x16e   : > { %2451 = vst [vmem:[%s6401_s17] sm:$0xff] %v1879_v7  ;;  %v1881_v11 = vpop.f32.mrb[1].mxu0  ;;  %4051 = vmatprep.subr.bf16.mxu0 %v4262_v1 }
 0x16f   : > { %2452 = vst [vmem:[%s6401_s17 + $0x8] sm:$0xff] %v1881_v11 }
 0x171   : > { %4053 = vmatpush1.bf16.msk.msra.mxu0 %vm4052_vm15, %v4260_v13 }
 0x172   : > { %4054 = vmatprep.subr.bf16.mxu0 %v4262_v1 }
 0x175   : > { %4056 = vmatpush1.bf16.msk.msra.mxu0 %vm4055_vm2, %v4260_v13 }
 0x176   : > { %4057 = vmatprep.subr.bf16.mxu0 %v4262_v1 }
 0x179   : > { %4059 = vmatpush1.bf16.msk.msra.mxu0 %vm4058_vm4, %v4260_v13 }
 0x17a   : > { %4060 = vmatprep.subr.bf16.mxu0 %v4262_v1 }
 0x17d   : > { %4062 = vmatpush1.bf16.msk.msra.mxu0 %vm4061_vm9, %v4260_v13 }
 0x17e   : > { %2437 = vmatprep.subr.mxu0 %v4261_v56 }
 0x181   : > { %3566 = vmatpush1.msk.msra.mxu0 %vm6696_vm12, %v3065_v12 }
 0x182   : > { %2446 = vmatmul.mubr.f32.vlgmr.msra.gmra.mrb[8].mxu0 %v6065_v37 }
 0x188   : > { %v1950_v14 = vpop.f32.mrb[0].mxu1 }
 0x189   : > { %2453 = vst [vmem:[%s6401_s17 + $0x10] sm:$0xff] %v1950_v14  ;;  %v1952_v15 = vpop.f32.mrb[1].mxu1 }
 0x18a   : > { %2454 = vst [vmem:[%s6401_s17 + $0x18] sm:$0xff] %v1952_v15 }
 0x1a7   : > { %v2021_v16 = vpop.f32.mrb[2].mxu0 }
 0x1a8   : > { %2455 = vst [vmem:[%s6401_s17 + $0x20] sm:$0xff] %v2021_v16  ;;  %v2023_v13 = vpop.f32.mrb[3].mxu0 }
 0x1a9   : > { %2456 = vst [vmem:[%s6401_s17 + $0x28] sm:$0xff] %v2023_v13 }
 0x1c2   : > { %v2092_v17 = vpop.f32.mrb[2].mxu1 }
 0x1c3   : > { %2457 = vst [vmem:[%s6401_s17 + $0x30] sm:$0xff] %v2092_v17  ;;  %v2094_v18 = vpop.f32.mrb[3].mxu1 }
 0x1c4   : > { %2458 = vst [vmem:[%s6401_s17 + $0x38] sm:$0xff] %v2094_v18 }
 0x1e1   : > { %v2163_v19 = vpop.f32.mrb[4].mxu0 }
 0x1e2   : > { %2459 = vst [vmem:[%s6401_s17 + $0x40] sm:$0xff] %v2163_v19  ;;  %v2165_v20 = vpop.f32.mrb[5].mxu0 }
 0x1e3   : > { %2460 = vst [vmem:[%s6401_s17 + $0x48] sm:$0xff] %v2165_v20 }
 0x1fd   : > { %v2234_v21 = vpop.f32.mrb[4].mxu1 }
 0x1fe   : > { %2461 = vst [vmem:[%s6401_s17 + $0x50] sm:$0xff] %v2234_v21  ;;  %v2236_v22 = vpop.f32.mrb[5].mxu1 }
 0x1ff   : > { %2462 = vst [vmem:[%s6401_s17 + $0x58] sm:$0xff] %v2236_v22 }
 0x21b   : > { %v2305_v23 = vpop.f32.mrb[6].mxu0 }
 0x21c   : > { %2463 = vst [vmem:[%s6401_s17 + $0x60] sm:$0xff] %v2305_v23  ;;  %v2307_v26 = vpop.f32.mrb[7].mxu0 }
 0x21d   : > { %2464 = vst [vmem:[%s6401_s17 + $0x68] sm:$0xff] %v2307_v26 }
 0x237   : > { %v2376_v27 = vpop.f32.mrb[6].mxu1 }
 0x238   : > { %2465 = vst [vmem:[%s6401_s17 + $0x70] sm:$0xff] %v2376_v27  ;;  %v2378_v30 = vpop.f32.mrb[7].mxu1 }
 0x239   : > { %2466 = vst [vmem:[%s6401_s17 + $0x78] sm:$0xff] %v2378_v30 }
 0x255   : > { %v2447_v31 = vpop.f32.mrb[8].mxu0 }
 0x256   : > { %2467 = vst [vmem:[%s6401_s17 + $0x80] sm:$0xff] %v2447_v31  ;;  %v2449_v34 = vpop.f32.mrb[9].mxu0 }
 0x257   : > { %4199 = shalt.err (!%p4196_p10)
}
 0x258   : > { %s4200_s6 = scalar_lea.hbm %s6450_s29, 2176  ;;  %s4204_s21 = scalar_lea.hbm %s6497_s2, 4352 }
 0x259   : > { %p4201_p1 = scmp.ne.s32.totalorder %s6450_s29, %s4200_s6  ;;  %p4205_p3 = scmp.lt.u32.totalorder %s6450_s29, %s6497_s2 }
 0x25a   : > { %p4206_p4 = scmp.lt.u32.totalorder %s4204_s21, %s4200_s6  ;;  %p4208_p6 = scmp.lt.u32.totalorder %s4200_s6, %s6450_s29 }
 0x25b   : > { %p4202_p2 = pnand %p4201_p1, %p4371_p8 }
 0x25c   : > { %p4207_p0 = por %p4206_p4, %p4205_p3 }
 0x25d   : > { %p4203_p7 = pneg %p4202_p2 }
 0x25e   : > { %p4209_p9 = por %p4208_p6, %p4207_p0 }
 0x260   : > { %p4210_p12 = pnand %p4209_p9, %p4203_p7 }
 0x262   : > { %4213 = shalt.err (!%p4210_p12)
}
 0x263   : > { %4072 = dma.vmem_to_hbm [thread:$0]  (%p4371_p8), %s6452_s26, 2176, %s6450_s29, %s2469_s30  }
 0x264 PF: > { %s2495_s22 = sand.u32 1, %s4244_s9   ;;  %p6697_p13 = scmp.ne.s32.totalorder %s6504_s16, 0 }
 0x265   : > { %p6698_p11 = scmp.ge.s32.totalorder %s4256_s12, 2  ;;  %s2496_s25 = scalar_lea.sflag [#allocation4], %s2495_s22 }
 0x267   : > { %p4083_p5 = pnand %p6698_p11, %p6697_p13 }
 0x269   : > { %4239 = dma.done.wait (!%p4083_p5), %s2496_s25, 2176  }
 0x26a   : > { %4241 = vsyncadd (!%p4083_p5), %s2496_s25, 4294965120  ;;  %p16_p10 = scmp.ge.s32.totalorder %s4327_s20, 4   ;;  %s6699_s9 = smov %s4248_s10 }
 0x26b   : > { %s6700_s10 = smov %s4252_s11  ;;  %s6701_s11 = smov %s4363_s7 }
 0x26c   : > { %s6702_s12 = smov %s4327_s20  ;;  %18 = sbr.rel (!%p16_p10) target bundleno = 6 (0x6), region = 78 }
 0x273   :  { %2501 = vsyncpa [#allocation3], 1 }
 0x274   :  { %2503 = vsyncpa [#allocation3 + $0x1], 1 }
 0x275   :  { %2504 = vsyncpa [#allocation6], 1 }
 0x276   :  { %2506 = vsyncpa [#allocation6 + $0x1], 1 }
 0x277   :  { %2507 = vsyncpa [#allocation4], 1 }
 0x278   :  { %2509 = vsyncpa [#allocation4 + $0x1], 1 }

</bundles_post_ra>
